<compile_context>
chip_gen: v7x
topology: tpu7x:2x2x1
jax: 0.10.0
libtpu: 0.0.40
codegen_flags: <defaults>
</compile_context>

<pallas_src>
import numpy as np
import jax
import jax.numpy as jnp
from jax.experimental import pallas as pl
from jax.experimental.pallas import tpu as pltpu


def _round_up(x, m):
    return ((x + m - 1) // m) * m


# ------------------------------ fused kernel --------------------------------

def _seq2seq_kernel(tf_ref,            # scalar prefetch: (T-1,) int32 (SMEM)
                    enc_xg_ref,        # (S, Bp, 4H)  encoder  x @ Wih + b per step
                    enc_whh_ref,       # (H, 4H)
                    dec_xg_ref,        # (T, Bp, 4H)  teacher-forced decoder x-gates
                    gate_tab_ref,      # (Vp, 4H)     dec emb @ Wih + b table (padded)
                    dec_whh_ref,       # (H, 4H)
                    wout_ref,          # (H, Vp)      vocab projection (padded)
                    bout_ref,          # (1, Vp)      bias (-1e30 on pad columns)
                    logits_ref):       # out: (T-1, Bp, Vp)
    H = enc_whh_ref.shape[0]
    Vp = wout_ref.shape[-1]
    S = enc_xg_ref.shape[0]
    Bp = enc_xg_ref.shape[1]
    Tm1 = logits_ref.shape[0]

    def lstm(gates, c):
        # torch.nn.LSTM gate order: [i, f, g, o]
        i = jax.nn.sigmoid(gates[:, 0 * H:1 * H])
        f = jax.nn.sigmoid(gates[:, 1 * H:2 * H])
        g = jnp.tanh(gates[:, 2 * H:3 * H])
        o = jax.nn.sigmoid(gates[:, 3 * H:4 * H])
        c_new = f * c + i * g
        return o * jnp.tanh(c_new), c_new

    # --------------------------- encoder recurrence -------------------------
    def enc_body(s, carry):
        h, c = carry
        gates = enc_xg_ref[s] + jnp.dot(h, enc_whh_ref[...],
                                        preferred_element_type=jnp.float32)
        return lstm(gates, c)

    h0 = jnp.zeros((Bp, H), jnp.float32)
    c0 = jnp.zeros((Bp, H), jnp.float32)
    h, c = jax.lax.fori_loop(0, S, enc_body, (h0, c0), unroll=True)

    # --------------------------- decoder recurrence -------------------------
    def dec_body(t, carry):
        h, c, xg = carry
        gates = xg + jnp.dot(h, dec_whh_ref[...],
                             preferred_element_type=jnp.float32)
        h, c = lstm(gates, c)

        logits = jnp.dot(h, wout_ref[...],
                         preferred_element_type=jnp.float32) + bout_ref[...]
        logits_ref[t] = logits          # lane-dense (Bp, Vp) store into the slab

        # Next-step input gates: teacher forcing (prefetched flag) vs. in-kernel
        # argmax -> one-hot -> gate-table matmul (first-max tie-break = argmax).
        lane = jax.lax.broadcasted_iota(jnp.int32, logits.shape, 1)
        m = jnp.max(logits, axis=-1, keepdims=True)
        idx = jnp.min(jnp.where(logits == m, lane, Vp), axis=-1, keepdims=True)
        best_oh = (lane == idx).astype(jnp.float32)
        best_xg = jnp.dot(best_oh, gate_tab_ref[...],
                          preferred_element_type=jnp.float32)
        use_teacher = tf_ref[t] > 0
        xg = jnp.where(use_teacher, dec_xg_ref[t + 1], best_xg)
        return h, c, xg

    jax.lax.fori_loop(0, Tm1, dec_body, (h, c, dec_xg_ref[0]), unroll=True)


# --------------------------- pallas_call wrapper -----------------------------

def _run_seq2seq(tf_flags, enc_xg, enc_whh, dec_xg, gate_tab, dec_whh,
                 wout, bout):
    S, Bp, G = enc_xg.shape
    T = dec_xg.shape[0]
    H = enc_whh.shape[0]
    Vp = wout.shape[-1]
    return pl.pallas_call(
        _seq2seq_kernel,
        out_shape=jax.ShapeDtypeStruct((T - 1, Bp, Vp), jnp.float32),
        grid_spec=pltpu.PrefetchScalarGridSpec(
            num_scalar_prefetch=1,
            grid=(1,),
            in_specs=[pl.BlockSpec((S, Bp, G), lambda i, tf: (0, 0, 0)),
                      pl.BlockSpec((H, G), lambda i, tf: (0, 0)),
                      pl.BlockSpec((T, Bp, G), lambda i, tf: (0, 0, 0)),
                      pl.BlockSpec((Vp, G), lambda i, tf: (0, 0)),
                      pl.BlockSpec((H, G), lambda i, tf: (0, 0)),
                      pl.BlockSpec((H, Vp), lambda i, tf: (0, 0)),
                      pl.BlockSpec((1, Vp), lambda i, tf: (0, 0))],
            out_specs=pl.BlockSpec((T - 1, Bp, Vp), lambda i, tf: (0, 0, 0))),
        compiler_params=pltpu.CompilerParams(
            dimension_semantics=("arbitrary",),
            vmem_limit_bytes=32 * 1024 * 1024),
    )(tf_flags, enc_xg, enc_whh, dec_xg, gate_tab, dec_whh, wout, bout)


# ------------------------------ Seq2Seq forward ------------------------------

@jax.jit
def seq2seq_forward(params, source, target, tf_flags):
    """source, target: int32 (seq_len, batch); tf_flags: int32 (tgt_len-1,).

    Returns float32 (tgt_len, batch, tgt_vocab); row 0 stays zeros, matching the
    PyTorch reference.
    """
    src_len, B = source.shape
    tgt_len = target.shape[0]
    V = params["dec_wout_t"].shape[1]

    Bp = max(8, _round_up(B, 8))      # sublane padding
    Vp = max(128, _round_up(V, 128))  # lane padding

    source_p = jnp.pad(source, ((0, 0), (0, Bp - B)))
    target_p = jnp.pad(target, ((0, 0), (0, Bp - B)))

    # Fold x @ Wih + b into the embedding tables once; gather per timestep.
    enc_tab = jnp.dot(params["enc_emb"], params["enc_wih_t"]) + params["enc_b"]
    enc_xg = jnp.take(enc_tab, source_p, axis=0)              # (S, Bp, 4H)

    dec_tab = jnp.dot(params["dec_emb"], params["dec_wih_t"]) + params["dec_b"]
    dec_xg = jnp.take(dec_tab, target_p, axis=0)              # (T, Bp, 4H) teacher path
    dec_tab_p = jnp.pad(dec_tab, ((0, Vp - V), (0, 0)))        # (Vp, 4H) argmax path

    wout_p = jnp.pad(params["dec_wout_t"], ((0, 0), (0, Vp - V)))
    bout_p = jnp.pad(params["dec_bout"], ((0, 0), (0, Vp - V)),
                     constant_values=-1e30)                    # pad cols never win argmax

    logits = _run_seq2seq(tf_flags.astype(jnp.int32), enc_xg,
                          params["enc_whh_t"], dec_xg, dec_tab_p,
                          params["dec_whh_t"], wout_p, bout_p)

    out = jnp.concatenate([jnp.zeros((1, Bp, Vp), jnp.float32), logits], axis=0)
    return out[:, :B, :V]


# --------------------------- plain-JAX reference ----------------------------

def seq2seq_reference(params, source, target, tf_flags):
    src_len, B = source.shape
    tgt_len = target.shape[0]
    H = params["enc_whh_t"].shape[0]
    V = params["dec_wout_t"].shape[1]

    def cell(x_emb, h, c, wih, whh, b):
        gates = x_emb @ wih + h @ whh + b
        i = jax.nn.sigmoid(gates[:, 0 * H:1 * H])
        f = jax.nn.sigmoid(gates[:, 1 * H:2 * H])
        g = jnp.tanh(gates[:, 2 * H:3 * H])
        o = jax.nn.sigmoid(gates[:, 3 * H:4 * H])
        c_new = f * c + i * g
        return o * jnp.tanh(c_new), c_new

    h = jnp.zeros((B, H), jnp.float32)
    c = jnp.zeros((B, H), jnp.float32)
    for s in range(src_len):
        x = params["enc_emb"][source[s]]
        h, c = cell(x, h, c, params["enc_wih_t"], params["enc_whh_t"],
                    params["enc_b"])

    outs = [jnp.zeros((B, V), jnp.float32)]
    x_tok = target[0]
    for t in range(1, tgt_len):
        x = params["dec_emb"][x_tok]
        h, c = cell(x, h, c, params["dec_wih_t"], params["dec_whh_t"],
                    params["dec_b"])
        logits = h @ params["dec_wout_t"] + params["dec_bout"]
        outs.append(logits)
        best = jnp.argmax(logits, axis=1).astype(target.dtype)
        x_tok = jnp.where(tf_flags[t - 1] > 0, target[t], best)
    return jnp.stack(outs, axis=0)


# --------------------------------- params -----------------------------------

def init_params(key, src_vocab, tgt_vocab, emb, hid):
    ks = jax.random.split(key, 10)
    s = 0.1
    return {
        "enc_emb":    s * jax.random.normal(ks[0], (src_vocab, emb), jnp.float32),
        "enc_wih_t":  s * jax.random.normal(ks[1], (emb, 4 * hid), jnp.float32),
        "enc_whh_t":  s * jax.random.normal(ks[2], (hid, 4 * hid), jnp.float32),
        "enc_b":      s * jax.random.normal(ks[3], (1, 4 * hid), jnp.float32),
        "dec_emb":    s * jax.random.normal(ks[4], (tgt_vocab, emb), jnp.float32),
        "dec_wih_t":  s * jax.random.normal(ks[5], (emb, 4 * hid), jnp.float32),
        "dec_whh_t":  s * jax.random.normal(ks[6], (hid, 4 * hid), jnp.float32),
        "dec_b":      s * jax.random.normal(ks[7], (1, 4 * hid), jnp.float32),
        "dec_wout_t": s * jax.random.normal(ks[8], (hid, tgt_vocab), jnp.float32),
        "dec_bout":   s * jax.random.normal(ks[9], (1, tgt_vocab), jnp.float32),
    }


# ---------------------------------- main -------------------------------------

if __name__ == "__main__":
    # TODO(synk): spacy/torchtext tokenization + vocab building are host-side
    # preprocessing with no Pallas equivalent; we start from integer token ids.
    SRC_VOCAB, TGT_VOCAB = 32, 32
    EMB, HID = 16, 32          # 4*HID = 128 -> lane-aligned gates
    B, SRC_LEN, TGT_LEN = 2, 8, 8
    TEACHER_FORCE_RATIO, SEED = 0.5, 0

    key = jax.random.PRNGKey(0)
    kp, ks, kt = jax.random.split(key, 3)
    params = init_params(kp, SRC_VOCAB, TGT_VOCAB, EMB, HID)

    source = jax.random.randint(ks, (SRC_LEN, B), 0, SRC_VOCAB, dtype=jnp.int32)
    target = jax.random.randint(kt, (TGT_LEN, B), 0, TGT_VOCAB, dtype=jnp.int32)

    # Deterministic replacement of the per-step `random.random() < ratio` draw,
    # precomputed so teacher forcing is data (not Python control flow) under jit.
    rng = np.random.RandomState(SEED)
    tf_flags = jnp.asarray(
        (rng.random(TGT_LEN - 1) < TEACHER_FORCE_RATIO).astype(np.int32))

    outputs = seq2seq_forward(params, source, target, tf_flags)
    jax.block_until_ready(outputs)
    assert outputs.shape == (TGT_LEN, B, TGT_VOCAB)

    ref = seq2seq_reference(params, source, target, tf_flags)
    np.testing.assert_allclose(np.asarray(outputs), np.asarray(ref),
                               rtol=2e-3, atol=2e-3)
    print("KERNEL_OK")
</pallas_src>

<mosaic_0001>
module attributes {stable_mosaic.version = 11 : i64} {
  func.func @_seq2seq_kernel(%arg0: i32, %arg1: memref<7xi32, #tpu.memory_space<smem>>, %arg2: memref<8x8x128xf32, #tpu.memory_space<vmem>>, %arg3: memref<32x128xf32, #tpu.memory_space<vmem>>, %arg4: memref<8x8x128xf32, #tpu.memory_space<vmem>>, %arg5: memref<128x128xf32, #tpu.memory_space<vmem>>, %arg6: memref<32x128xf32, #tpu.memory_space<vmem>>, %arg7: memref<32x128xf32, #tpu.memory_space<vmem>>, %arg8: memref<1x128xf32, #tpu.memory_space<vmem>>, %arg9: memref<7x8x128xf32, #tpu.memory_space<vmem>>) attributes {dimension_semantics = [#tpu.dimension_semantics<arbitrary>], iteration_bounds = array<i64: 1>, scalar_prefetch = 1 : i64, scratch_operands = 0 : i64, tpu.core_type = #tpu.core_type<tc>, window_params = [{pipeline_mode = #tpu.pipeline_mode<synchronous>, transform_indices = @transform_0, window_bounds = array<i64: 8, 8, 128>}, {pipeline_mode = #tpu.pipeline_mode<synchronous>, transform_indices = @transform_1, window_bounds = array<i64: 32, 128>}, {pipeline_mode = #tpu.pipeline_mode<synchronous>, transform_indices = @transform_2, window_bounds = array<i64: 8, 8, 128>}, {pipeline_mode = #tpu.pipeline_mode<synchronous>, transform_indices = @transform_3, window_bounds = array<i64: 128, 128>}, {pipeline_mode = #tpu.pipeline_mode<synchronous>, transform_indices = @transform_4, window_bounds = array<i64: 32, 128>}, {pipeline_mode = #tpu.pipeline_mode<synchronous>, transform_indices = @transform_5, window_bounds = array<i64: 32, 128>}, {pipeline_mode = #tpu.pipeline_mode<synchronous>, transform_indices = @transform_6, window_bounds = array<i64: 1, 128>}, {pipeline_mode = #tpu.pipeline_mode<synchronous>, transform_indices = @transform_7, window_bounds = array<i64: 7, 8, 128>}]} {
    %cst = arith.constant 0.000000e+00 : f32
    %0 = vector.broadcast %cst : f32 to vector<8x32xf32>
    %cst_0 = arith.constant 0.000000e+00 : f32
    %1 = vector.broadcast %cst_0 : f32 to vector<8x32xf32>
    %c0_i32 = arith.constant 0 : i32
    %2 = arith.index_cast %c0_i32 : i32 to index
    %c0 = arith.constant 0 : index
    %c0_1 = arith.constant 0 : index
    %3 = vector.load %arg2[%2, %c0, %c0_1] : memref<8x8x128xf32, #tpu.memory_space<vmem>>, vector<1x8x128xf32>
    %4 = vector.shape_cast %3 : vector<1x8x128xf32> to vector<8x128xf32>
    %c0_2 = arith.constant 0 : index
    %c0_3 = arith.constant 0 : index
    %5 = vector.load %arg3[%c0_2, %c0_3] : memref<32x128xf32, #tpu.memory_space<vmem>>, vector<32x128xf32>
    %cst_4 = arith.constant dense<0.000000e+00> : vector<8x128xf32>
    %6 = tpu.matmul %0, %5, %cst_4 {dimension_numbers = #tpu.dot_dimension_numbers<[1], [0], [0], [1], [0, 0, 1, 1], [], []>} : vector<8x32xf32>, vector<32x128xf32>, vector<8x128xf32> -> vector<8x128xf32>
    %7 = arith.addf %4, %6 : vector<8x128xf32>
    %8 = vector.extract_strided_slice %7 {offsets = [0, 0], sizes = [8, 32], strides = [1, 1]} : vector<8x128xf32> to vector<8x32xf32>
    %9 = arith.negf %8 : vector<8x32xf32>
    %10 = math.exp %9 : vector<8x32xf32>
    %cst_5 = arith.constant 1.000000e+00 : f32
    %11 = vector.broadcast %cst_5 : f32 to vector<8x32xf32>
    %12 = arith.addf %11, %10 : vector<8x32xf32>
    %13 = arith.divf %11, %12 : vector<8x32xf32>
    %14 = vector.extract_strided_slice %7 {offsets = [0, 32], sizes = [8, 32], strides = [1, 1]} : vector<8x128xf32> to vector<8x32xf32>
    %15 = arith.negf %14 : vector<8x32xf32>
    %16 = math.exp %15 : vector<8x32xf32>
    %cst_6 = arith.constant 1.000000e+00 : f32
    %17 = vector.broadcast %cst_6 : f32 to vector<8x32xf32>
    %18 = arith.addf %17, %16 : vector<8x32xf32>
    %19 = arith.divf %17, %18 : vector<8x32xf32>
    %20 = vector.extract_strided_slice %7 {offsets = [0, 64], sizes = [8, 32], strides = [1, 1]} : vector<8x128xf32> to vector<8x32xf32>
    %21 = math.tanh %20 : vector<8x32xf32>
    %22 = vector.extract_strided_slice %7 {offsets = [0, 96], sizes = [8, 32], strides = [1, 1]} : vector<8x128xf32> to vector<8x32xf32>
    %23 = arith.negf %22 : vector<8x32xf32>
    %24 = math.exp %23 : vector<8x32xf32>
    %cst_7 = arith.constant 1.000000e+00 : f32
    %25 = vector.broadcast %cst_7 : f32 to vector<8x32xf32>
    %26 = arith.addf %25, %24 : vector<8x32xf32>
    %27 = arith.divf %25, %26 : vector<8x32xf32>
    %28 = arith.mulf %19, %1 : vector<8x32xf32>
    %29 = arith.mulf %13, %21 : vector<8x32xf32>
    %30 = arith.addf %28, %29 : vector<8x32xf32>
    %31 = math.tanh %30 : vector<8x32xf32>
    %32 = arith.mulf %27, %31 : vector<8x32xf32>
    %c1_i32 = arith.constant 1 : i32
    %33 = arith.index_cast %c1_i32 : i32 to index
    %c0_8 = arith.constant 0 : index
    %c0_9 = arith.constant 0 : index
    %34 = vector.load %arg2[%33, %c0_8, %c0_9] : memref<8x8x128xf32, #tpu.memory_space<vmem>>, vector<1x8x128xf32>
    %35 = vector.shape_cast %34 : vector<1x8x128xf32> to vector<8x128xf32>
    %c0_10 = arith.constant 0 : index
    %c0_11 = arith.constant 0 : index
    %36 = vector.load %arg3[%c0_10, %c0_11] : memref<32x128xf32, #tpu.memory_space<vmem>>, vector<32x128xf32>
    %cst_12 = arith.constant dense<0.000000e+00> : vector<8x128xf32>
    %37 = tpu.matmul %32, %36, %cst_12 {dimension_numbers = #tpu.dot_dimension_numbers<[1], [0], [0], [1], [0, 0, 1, 1], [], []>} : vector<8x32xf32>, vector<32x128xf32>, vector<8x128xf32> -> vector<8x128xf32>
    %38 = arith.addf %35, %37 : vector<8x128xf32>
    %39 = vector.extract_strided_slice %38 {offsets = [0, 0], sizes = [8, 32], strides = [1, 1]} : vector<8x128xf32> to vector<8x32xf32>
    %40 = arith.negf %39 : vector<8x32xf32>
    %41 = math.exp %40 : vector<8x32xf32>
    %cst_13 = arith.constant 1.000000e+00 : f32
    %42 = vector.broadcast %cst_13 : f32 to vector<8x32xf32>
    %43 = arith.addf %42, %41 : vector<8x32xf32>
    %44 = arith.divf %42, %43 : vector<8x32xf32>
    %45 = vector.extract_strided_slice %38 {offsets = [0, 32], sizes = [8, 32], strides = [1, 1]} : vector<8x128xf32> to vector<8x32xf32>
    %46 = arith.negf %45 : vector<8x32xf32>
    %47 = math.exp %46 : vector<8x32xf32>
    %cst_14 = arith.constant 1.000000e+00 : f32
    %48 = vector.broadcast %cst_14 : f32 to vector<8x32xf32>
    %49 = arith.addf %48, %47 : vector<8x32xf32>
    %50 = arith.divf %48, %49 : vector<8x32xf32>
    %51 = vector.extract_strided_slice %38 {offsets = [0, 64], sizes = [8, 32], strides = [1, 1]} : vector<8x128xf32> to vector<8x32xf32>
    %52 = math.tanh %51 : vector<8x32xf32>
    %53 = vector.extract_strided_slice %38 {offsets = [0, 96], sizes = [8, 32], strides = [1, 1]} : vector<8x128xf32> to vector<8x32xf32>
    %54 = arith.negf %53 : vector<8x32xf32>
    %55 = math.exp %54 : vector<8x32xf32>
    %cst_15 = arith.constant 1.000000e+00 : f32
    %56 = vector.broadcast %cst_15 : f32 to vector<8x32xf32>
    %57 = arith.addf %56, %55 : vector<8x32xf32>
    %58 = arith.divf %56, %57 : vector<8x32xf32>
    %59 = arith.mulf %50, %30 : vector<8x32xf32>
    %60 = arith.mulf %44, %52 : vector<8x32xf32>
    %61 = arith.addf %59, %60 : vector<8x32xf32>
    %62 = math.tanh %61 : vector<8x32xf32>
    %63 = arith.mulf %58, %62 : vector<8x32xf32>
    %c2_i32 = arith.constant 2 : i32
    %64 = arith.index_cast %c2_i32 : i32 to index
    %c0_16 = arith.constant 0 : index
    %c0_17 = arith.constant 0 : index
    %65 = vector.load %arg2[%64, %c0_16, %c0_17] : memref<8x8x128xf32, #tpu.memory_space<vmem>>, vector<1x8x128xf32>
    %66 = vector.shape_cast %65 : vector<1x8x128xf32> to vector<8x128xf32>
    %c0_18 = arith.constant 0 : index
    %c0_19 = arith.constant 0 : index
    %67 = vector.load %arg3[%c0_18, %c0_19] : memref<32x128xf32, #tpu.memory_space<vmem>>, vector<32x128xf32>
    %cst_20 = arith.constant dense<0.000000e+00> : vector<8x128xf32>
    %68 = tpu.matmul %63, %67, %cst_20 {dimension_numbers = #tpu.dot_dimension_numbers<[1], [0], [0], [1], [0, 0, 1, 1], [], []>} : vector<8x32xf32>, vector<32x128xf32>, vector<8x128xf32> -> vector<8x128xf32>
    %69 = arith.addf %66, %68 : vector<8x128xf32>
    %70 = vector.extract_strided_slice %69 {offsets = [0, 0], sizes = [8, 32], strides = [1, 1]} : vector<8x128xf32> to vector<8x32xf32>
    %71 = arith.negf %70 : vector<8x32xf32>
    %72 = math.exp %71 : vector<8x32xf32>
    %cst_21 = arith.constant 1.000000e+00 : f32
    %73 = vector.broadcast %cst_21 : f32 to vector<8x32xf32>
    %74 = arith.addf %73, %72 : vector<8x32xf32>
    %75 = arith.divf %73, %74 : vector<8x32xf32>
    %76 = vector.extract_strided_slice %69 {offsets = [0, 32], sizes = [8, 32], strides = [1, 1]} : vector<8x128xf32> to vector<8x32xf32>
    %77 = arith.negf %76 : vector<8x32xf32>
    %78 = math.exp %77 : vector<8x32xf32>
    %cst_22 = arith.constant 1.000000e+00 : f32
    %79 = vector.broadcast %cst_22 : f32 to vector<8x32xf32>
    %80 = arith.addf %79, %78 : vector<8x32xf32>
    %81 = arith.divf %79, %80 : vector<8x32xf32>
    %82 = vector.extract_strided_slice %69 {offsets = [0, 64], sizes = [8, 32], strides = [1, 1]} : vector<8x128xf32> to vector<8x32xf32>
    %83 = math.tanh %82 : vector<8x32xf32>
    %84 = vector.extract_strided_slice %69 {offsets = [0, 96], sizes = [8, 32], strides = [1, 1]} : vector<8x128xf32> to vector<8x32xf32>
    %85 = arith.negf %84 : vector<8x32xf32>
    %86 = math.exp %85 : vector<8x32xf32>
    %cst_23 = arith.constant 1.000000e+00 : f32
    %87 = vector.broadcast %cst_23 : f32 to vector<8x32xf32>
    %88 = arith.addf %87, %86 : vector<8x32xf32>
    %89 = arith.divf %87, %88 : vector<8x32xf32>
    %90 = arith.mulf %81, %61 : vector<8x32xf32>
    %91 = arith.mulf %75, %83 : vector<8x32xf32>
    %92 = arith.addf %90, %91 : vector<8x32xf32>
    %93 = math.tanh %92 : vector<8x32xf32>
    %94 = arith.mulf %89, %93 : vector<8x32xf32>
    %c3_i32 = arith.constant 3 : i32
    %95 = arith.index_cast %c3_i32 : i32 to index
    %c0_24 = arith.constant 0 : index
    %c0_25 = arith.constant 0 : index
    %96 = vector.load %arg2[%95, %c0_24, %c0_25] : memref<8x8x128xf32, #tpu.memory_space<vmem>>, vector<1x8x128xf32>
    %97 = vector.shape_cast %96 : vector<1x8x128xf32> to vector<8x128xf32>
    %c0_26 = arith.constant 0 : index
    %c0_27 = arith.constant 0 : index
    %98 = vector.load %arg3[%c0_26, %c0_27] : memref<32x128xf32, #tpu.memory_space<vmem>>, vector<32x128xf32>
    %cst_28 = arith.constant dense<0.000000e+00> : vector<8x128xf32>
    %99 = tpu.matmul %94, %98, %cst_28 {dimension_numbers = #tpu.dot_dimension_numbers<[1], [0], [0], [1], [0, 0, 1, 1], [], []>} : vector<8x32xf32>, vector<32x128xf32>, vector<8x128xf32> -> vector<8x128xf32>
    %100 = arith.addf %97, %99 : vector<8x128xf32>
    %101 = vector.extract_strided_slice %100 {offsets = [0, 0], sizes = [8, 32], strides = [1, 1]} : vector<8x128xf32> to vector<8x32xf32>
    %102 = arith.negf %101 : vector<8x32xf32>
    %103 = math.exp %102 : vector<8x32xf32>
    %cst_29 = arith.constant 1.000000e+00 : f32
    %104 = vector.broadcast %cst_29 : f32 to vector<8x32xf32>
    %105 = arith.addf %104, %103 : vector<8x32xf32>
    %106 = arith.divf %104, %105 : vector<8x32xf32>
    %107 = vector.extract_strided_slice %100 {offsets = [0, 32], sizes = [8, 32], strides = [1, 1]} : vector<8x128xf32> to vector<8x32xf32>
    %108 = arith.negf %107 : vector<8x32xf32>
    %109 = math.exp %108 : vector<8x32xf32>
    %cst_30 = arith.constant 1.000000e+00 : f32
    %110 = vector.broadcast %cst_30 : f32 to vector<8x32xf32>
    %111 = arith.addf %110, %109 : vector<8x32xf32>
    %112 = arith.divf %110, %111 : vector<8x32xf32>
    %113 = vector.extract_strided_slice %100 {offsets = [0, 64], sizes = [8, 32], strides = [1, 1]} : vector<8x128xf32> to vector<8x32xf32>
    %114 = math.tanh %113 : vector<8x32xf32>
    %115 = vector.extract_strided_slice %100 {offsets = [0, 96], sizes = [8, 32], strides = [1, 1]} : vector<8x128xf32> to vector<8x32xf32>
    %116 = arith.negf %115 : vector<8x32xf32>
    %117 = math.exp %116 : vector<8x32xf32>
    %cst_31 = arith.constant 1.000000e+00 : f32
    %118 = vector.broadcast %cst_31 : f32 to vector<8x32xf32>
    %119 = arith.addf %118, %117 : vector<8x32xf32>
    %120 = arith.divf %118, %119 : vector<8x32xf32>
    %121 = arith.mulf %112, %92 : vector<8x32xf32>
    %122 = arith.mulf %106, %114 : vector<8x32xf32>
    %123 = arith.addf %121, %122 : vector<8x32xf32>
    %124 = math.tanh %123 : vector<8x32xf32>
    %125 = arith.mulf %120, %124 : vector<8x32xf32>
    %c4_i32 = arith.constant 4 : i32
    %126 = arith.index_cast %c4_i32 : i32 to index
    %c0_32 = arith.constant 0 : index
    %c0_33 = arith.constant 0 : index
    %127 = vector.load %arg2[%126, %c0_32, %c0_33] : memref<8x8x128xf32, #tpu.memory_space<vmem>>, vector<1x8x128xf32>
    %128 = vector.shape_cast %127 : vector<1x8x128xf32> to vector<8x128xf32>
    %c0_34 = arith.constant 0 : index
    %c0_35 = arith.constant 0 : index
    %129 = vector.load %arg3[%c0_34, %c0_35] : memref<32x128xf32, #tpu.memory_space<vmem>>, vector<32x128xf32>
    %cst_36 = arith.constant dense<0.000000e+00> : vector<8x128xf32>
    %130 = tpu.matmul %125, %129, %cst_36 {dimension_numbers = #tpu.dot_dimension_numbers<[1], [0], [0], [1], [0, 0, 1, 1], [], []>} : vector<8x32xf32>, vector<32x128xf32>, vector<8x128xf32> -> vector<8x128xf32>
    %131 = arith.addf %128, %130 : vector<8x128xf32>
    %132 = vector.extract_strided_slice %131 {offsets = [0, 0], sizes = [8, 32], strides = [1, 1]} : vector<8x128xf32> to vector<8x32xf32>
    %133 = arith.negf %132 : vector<8x32xf32>
    %134 = math.exp %133 : vector<8x32xf32>
    %cst_37 = arith.constant 1.000000e+00 : f32
    %135 = vector.broadcast %cst_37 : f32 to vector<8x32xf32>
    %136 = arith.addf %135, %134 : vector<8x32xf32>
    %137 = arith.divf %135, %136 : vector<8x32xf32>
    %138 = vector.extract_strided_slice %131 {offsets = [0, 32], sizes = [8, 32], strides = [1, 1]} : vector<8x128xf32> to vector<8x32xf32>
    %139 = arith.negf %138 : vector<8x32xf32>
    %140 = math.exp %139 : vector<8x32xf32>
    %cst_38 = arith.constant 1.000000e+00 : f32
    %141 = vector.broadcast %cst_38 : f32 to vector<8x32xf32>
    %142 = arith.addf %141, %140 : vector<8x32xf32>
    %143 = arith.divf %141, %142 : vector<8x32xf32>
    %144 = vector.extract_strided_slice %131 {offsets = [0, 64], sizes = [8, 32], strides = [1, 1]} : vector<8x128xf32> to vector<8x32xf32>
    %145 = math.tanh %144 : vector<8x32xf32>
    %146 = vector.extract_strided_slice %131 {offsets = [0, 96], sizes = [8, 32], strides = [1, 1]} : vector<8x128xf32> to vector<8x32xf32>
    %147 = arith.negf %146 : vector<8x32xf32>
    %148 = math.exp %147 : vector<8x32xf32>
    %cst_39 = arith.constant 1.000000e+00 : f32
    %149 = vector.broadcast %cst_39 : f32 to vector<8x32xf32>
    %150 = arith.addf %149, %148 : vector<8x32xf32>
    %151 = arith.divf %149, %150 : vector<8x32xf32>
    %152 = arith.mulf %143, %123 : vector<8x32xf32>
    %153 = arith.mulf %137, %145 : vector<8x32xf32>
    %154 = arith.addf %152, %153 : vector<8x32xf32>
    %155 = math.tanh %154 : vector<8x32xf32>
    %156 = arith.mulf %151, %155 : vector<8x32xf32>
    %c5_i32 = arith.constant 5 : i32
    %157 = arith.index_cast %c5_i32 : i32 to index
    %c0_40 = arith.constant 0 : index
    %c0_41 = arith.constant 0 : index
    %158 = vector.load %arg2[%157, %c0_40, %c0_41] : memref<8x8x128xf32, #tpu.memory_space<vmem>>, vector<1x8x128xf32>
    %159 = vector.shape_cast %158 : vector<1x8x128xf32> to vector<8x128xf32>
    %c0_42 = arith.constant 0 : index
    %c0_43 = arith.constant 0 : index
    %160 = vector.load %arg3[%c0_42, %c0_43] : memref<32x128xf32, #tpu.memory_space<vmem>>, vector<32x128xf32>
    %cst_44 = arith.constant dense<0.000000e+00> : vector<8x128xf32>
    %161 = tpu.matmul %156, %160, %cst_44 {dimension_numbers = #tpu.dot_dimension_numbers<[1], [0], [0], [1], [0, 0, 1, 1], [], []>} : vector<8x32xf32>, vector<32x128xf32>, vector<8x128xf32> -> vector<8x128xf32>
    %162 = arith.addf %159, %161 : vector<8x128xf32>
    %163 = vector.extract_strided_slice %162 {offsets = [0, 0], sizes = [8, 32], strides = [1, 1]} : vector<8x128xf32> to vector<8x32xf32>
    %164 = arith.negf %163 : vector<8x32xf32>
    %165 = math.exp %164 : vector<8x32xf32>
    %cst_45 = arith.constant 1.000000e+00 : f32
    %166 = vector.broadcast %cst_45 : f32 to vector<8x32xf32>
    %167 = arith.addf %166, %165 : vector<8x32xf32>
    %168 = arith.divf %166, %167 : vector<8x32xf32>
    %169 = vector.extract_strided_slice %162 {offsets = [0, 32], sizes = [8, 32], strides = [1, 1]} : vector<8x128xf32> to vector<8x32xf32>
    %170 = arith.negf %169 : vector<8x32xf32>
    %171 = math.exp %170 : vector<8x32xf32>
    %cst_46 = arith.constant 1.000000e+00 : f32
    %172 = vector.broadcast %cst_46 : f32 to vector<8x32xf32>
    %173 = arith.addf %172, %171 : vector<8x32xf32>
    %174 = arith.divf %172, %173 : vector<8x32xf32>
    %175 = vector.extract_strided_slice %162 {offsets = [0, 64], sizes = [8, 32], strides = [1, 1]} : vector<8x128xf32> to vector<8x32xf32>
    %176 = math.tanh %175 : vector<8x32xf32>
    %177 = vector.extract_strided_slice %162 {offsets = [0, 96], sizes = [8, 32], strides = [1, 1]} : vector<8x128xf32> to vector<8x32xf32>
    %178 = arith.negf %177 : vector<8x32xf32>
    %179 = math.exp %178 : vector<8x32xf32>
    %cst_47 = arith.constant 1.000000e+00 : f32
    %180 = vector.broadcast %cst_47 : f32 to vector<8x32xf32>
    %181 = arith.addf %180, %179 : vector<8x32xf32>
    %182 = arith.divf %180, %181 : vector<8x32xf32>
    %183 = arith.mulf %174, %154 : vector<8x32xf32>
    %184 = arith.mulf %168, %176 : vector<8x32xf32>
    %185 = arith.addf %183, %184 : vector<8x32xf32>
    %186 = math.tanh %185 : vector<8x32xf32>
    %187 = arith.mulf %182, %186 : vector<8x32xf32>
    %c6_i32 = arith.constant 6 : i32
    %188 = arith.index_cast %c6_i32 : i32 to index
    %c0_48 = arith.constant 0 : index
    %c0_49 = arith.constant 0 : index
    %189 = vector.load %arg2[%188, %c0_48, %c0_49] : memref<8x8x128xf32, #tpu.memory_space<vmem>>, vector<1x8x128xf32>
    %190 = vector.shape_cast %189 : vector<1x8x128xf32> to vector<8x128xf32>
    %c0_50 = arith.constant 0 : index
    %c0_51 = arith.constant 0 : index
    %191 = vector.load %arg3[%c0_50, %c0_51] : memref<32x128xf32, #tpu.memory_space<vmem>>, vector<32x128xf32>
    %cst_52 = arith.constant dense<0.000000e+00> : vector<8x128xf32>
    %192 = tpu.matmul %187, %191, %cst_52 {dimension_numbers = #tpu.dot_dimension_numbers<[1], [0], [0], [1], [0, 0, 1, 1], [], []>} : vector<8x32xf32>, vector<32x128xf32>, vector<8x128xf32> -> vector<8x128xf32>
    %193 = arith.addf %190, %192 : vector<8x128xf32>
    %194 = vector.extract_strided_slice %193 {offsets = [0, 0], sizes = [8, 32], strides = [1, 1]} : vector<8x128xf32> to vector<8x32xf32>
    %195 = arith.negf %194 : vector<8x32xf32>
    %196 = math.exp %195 : vector<8x32xf32>
    %cst_53 = arith.constant 1.000000e+00 : f32
    %197 = vector.broadcast %cst_53 : f32 to vector<8x32xf32>
    %198 = arith.addf %197, %196 : vector<8x32xf32>
    %199 = arith.divf %197, %198 : vector<8x32xf32>
    %200 = vector.extract_strided_slice %193 {offsets = [0, 32], sizes = [8, 32], strides = [1, 1]} : vector<8x128xf32> to vector<8x32xf32>
    %201 = arith.negf %200 : vector<8x32xf32>
    %202 = math.exp %201 : vector<8x32xf32>
    %cst_54 = arith.constant 1.000000e+00 : f32
    %203 = vector.broadcast %cst_54 : f32 to vector<8x32xf32>
    %204 = arith.addf %203, %202 : vector<8x32xf32>
    %205 = arith.divf %203, %204 : vector<8x32xf32>
    %206 = vector.extract_strided_slice %193 {offsets = [0, 64], sizes = [8, 32], strides = [1, 1]} : vector<8x128xf32> to vector<8x32xf32>
    %207 = math.tanh %206 : vector<8x32xf32>
    %208 = vector.extract_strided_slice %193 {offsets = [0, 96], sizes = [8, 32], strides = [1, 1]} : vector<8x128xf32> to vector<8x32xf32>
    %209 = arith.negf %208 : vector<8x32xf32>
    %210 = math.exp %209 : vector<8x32xf32>
    %cst_55 = arith.constant 1.000000e+00 : f32
    %211 = vector.broadcast %cst_55 : f32 to vector<8x32xf32>
    %212 = arith.addf %211, %210 : vector<8x32xf32>
    %213 = arith.divf %211, %212 : vector<8x32xf32>
    %214 = arith.mulf %205, %185 : vector<8x32xf32>
    %215 = arith.mulf %199, %207 : vector<8x32xf32>
    %216 = arith.addf %214, %215 : vector<8x32xf32>
    %217 = math.tanh %216 : vector<8x32xf32>
    %218 = arith.mulf %213, %217 : vector<8x32xf32>
    %c7_i32 = arith.constant 7 : i32
    %219 = arith.index_cast %c7_i32 : i32 to index
    %c0_56 = arith.constant 0 : index
    %c0_57 = arith.constant 0 : index
    %220 = vector.load %arg2[%219, %c0_56, %c0_57] : memref<8x8x128xf32, #tpu.memory_space<vmem>>, vector<1x8x128xf32>
    %221 = vector.shape_cast %220 : vector<1x8x128xf32> to vector<8x128xf32>
    %c0_58 = arith.constant 0 : index
    %c0_59 = arith.constant 0 : index
    %222 = vector.load %arg3[%c0_58, %c0_59] : memref<32x128xf32, #tpu.memory_space<vmem>>, vector<32x128xf32>
    %cst_60 = arith.constant dense<0.000000e+00> : vector<8x128xf32>
    %223 = tpu.matmul %218, %222, %cst_60 {dimension_numbers = #tpu.dot_dimension_numbers<[1], [0], [0], [1], [0, 0, 1, 1], [], []>} : vector<8x32xf32>, vector<32x128xf32>, vector<8x128xf32> -> vector<8x128xf32>
    %224 = arith.addf %221, %223 : vector<8x128xf32>
    %225 = vector.extract_strided_slice %224 {offsets = [0, 0], sizes = [8, 32], strides = [1, 1]} : vector<8x128xf32> to vector<8x32xf32>
    %226 = arith.negf %225 : vector<8x32xf32>
    %227 = math.exp %226 : vector<8x32xf32>
    %cst_61 = arith.constant 1.000000e+00 : f32
    %228 = vector.broadcast %cst_61 : f32 to vector<8x32xf32>
    %229 = arith.addf %228, %227 : vector<8x32xf32>
    %230 = arith.divf %228, %229 : vector<8x32xf32>
    %231 = vector.extract_strided_slice %224 {offsets = [0, 32], sizes = [8, 32], strides = [1, 1]} : vector<8x128xf32> to vector<8x32xf32>
    %232 = arith.negf %231 : vector<8x32xf32>
    %233 = math.exp %232 : vector<8x32xf32>
    %cst_62 = arith.constant 1.000000e+00 : f32
    %234 = vector.broadcast %cst_62 : f32 to vector<8x32xf32>
    %235 = arith.addf %234, %233 : vector<8x32xf32>
    %236 = arith.divf %234, %235 : vector<8x32xf32>
    %237 = vector.extract_strided_slice %224 {offsets = [0, 64], sizes = [8, 32], strides = [1, 1]} : vector<8x128xf32> to vector<8x32xf32>
    %238 = math.tanh %237 : vector<8x32xf32>
    %239 = vector.extract_strided_slice %224 {offsets = [0, 96], sizes = [8, 32], strides = [1, 1]} : vector<8x128xf32> to vector<8x32xf32>
    %240 = arith.negf %239 : vector<8x32xf32>
    %241 = math.exp %240 : vector<8x32xf32>
    %cst_63 = arith.constant 1.000000e+00 : f32
    %242 = vector.broadcast %cst_63 : f32 to vector<8x32xf32>
    %243 = arith.addf %242, %241 : vector<8x32xf32>
    %244 = arith.divf %242, %243 : vector<8x32xf32>
    %245 = arith.mulf %236, %216 : vector<8x32xf32>
    %246 = arith.mulf %230, %238 : vector<8x32xf32>
    %247 = arith.addf %245, %246 : vector<8x32xf32>
    %248 = math.tanh %247 : vector<8x32xf32>
    %249 = arith.mulf %244, %248 : vector<8x32xf32>
    %c8_i32 = arith.constant 8 : i32
    %c0_64 = arith.constant 0 : index
    %c0_65 = arith.constant 0 : index
    %c0_66 = arith.constant 0 : index
    %250 = vector.load %arg4[%c0_64, %c0_65, %c0_66] : memref<8x8x128xf32, #tpu.memory_space<vmem>>, vector<1x8x128xf32>
    %251 = vector.shape_cast %250 : vector<1x8x128xf32> to vector<8x128xf32>
    %c0_i32_67 = arith.constant 0 : i32
    %c0_68 = arith.constant 0 : index
    %c0_69 = arith.constant 0 : index
    %252 = vector.load %arg6[%c0_68, %c0_69] : memref<32x128xf32, #tpu.memory_space<vmem>>, vector<32x128xf32>
    %cst_70 = arith.constant dense<0.000000e+00> : vector<8x128xf32>
    %253 = tpu.matmul %249, %252, %cst_70 {dimension_numbers = #tpu.dot_dimension_numbers<[1], [0], [0], [1], [0, 0, 1, 1], [], []>} : vector<8x32xf32>, vector<32x128xf32>, vector<8x128xf32> -> vector<8x128xf32>
    %254 = arith.addf %251, %253 : vector<8x128xf32>
    %255 = vector.extract_strided_slice %254 {offsets = [0, 0], sizes = [8, 32], strides = [1, 1]} : vector<8x128xf32> to vector<8x32xf32>
    %256 = arith.negf %255 : vector<8x32xf32>
    %257 = math.exp %256 : vector<8x32xf32>
    %cst_71 = arith.constant 1.000000e+00 : f32
    %258 = vector.broadcast %cst_71 : f32 to vector<8x32xf32>
    %259 = arith.addf %258, %257 : vector<8x32xf32>
    %260 = arith.divf %258, %259 : vector<8x32xf32>
    %261 = vector.extract_strided_slice %254 {offsets = [0, 32], sizes = [8, 32], strides = [1, 1]} : vector<8x128xf32> to vector<8x32xf32>
    %262 = arith.negf %261 : vector<8x32xf32>
    %263 = math.exp %262 : vector<8x32xf32>
    %cst_72 = arith.constant 1.000000e+00 : f32
    %264 = vector.broadcast %cst_72 : f32 to vector<8x32xf32>
    %265 = arith.addf %264, %263 : vector<8x32xf32>
    %266 = arith.divf %264, %265 : vector<8x32xf32>
    %267 = vector.extract_strided_slice %254 {offsets = [0, 64], sizes = [8, 32], strides = [1, 1]} : vector<8x128xf32> to vector<8x32xf32>
    %268 = math.tanh %267 : vector<8x32xf32>
    %269 = vector.extract_strided_slice %254 {offsets = [0, 96], sizes = [8, 32], strides = [1, 1]} : vector<8x128xf32> to vector<8x32xf32>
    %270 = arith.negf %269 : vector<8x32xf32>
    %271 = math.exp %270 : vector<8x32xf32>
    %cst_73 = arith.constant 1.000000e+00 : f32
    %272 = vector.broadcast %cst_73 : f32 to vector<8x32xf32>
    %273 = arith.addf %272, %271 : vector<8x32xf32>
    %274 = arith.divf %272, %273 : vector<8x32xf32>
    %275 = arith.mulf %266, %247 : vector<8x32xf32>
    %276 = arith.mulf %260, %268 : vector<8x32xf32>
    %277 = arith.addf %275, %276 : vector<8x32xf32>
    %278 = math.tanh %277 : vector<8x32xf32>
    %279 = arith.mulf %274, %278 : vector<8x32xf32>
    %c0_74 = arith.constant 0 : index
    %c0_75 = arith.constant 0 : index
    %280 = vector.load %arg7[%c0_74, %c0_75] : memref<32x128xf32, #tpu.memory_space<vmem>>, vector<32x128xf32>
    %cst_76 = arith.constant dense<0.000000e+00> : vector<8x128xf32>
    %281 = tpu.matmul %279, %280, %cst_76 {dimension_numbers = #tpu.dot_dimension_numbers<[1], [0], [0], [1], [0, 0, 1, 1], [], []>} : vector<8x32xf32>, vector<32x128xf32>, vector<8x128xf32> -> vector<8x128xf32>
    %c0_77 = arith.constant 0 : index
    %c0_78 = arith.constant 0 : index
    %282 = vector.load %arg8[%c0_77, %c0_78] : memref<1x128xf32, #tpu.memory_space<vmem>>, vector<1x128xf32>
    %283 = vector.broadcast %282 : vector<1x128xf32> to vector<8x128xf32>
    %284 = arith.addf %281, %283 : vector<8x128xf32>
    %285 = arith.index_cast %c0_i32_67 : i32 to index
    %c0_79 = arith.constant 0 : index
    %c0_80 = arith.constant 0 : index
    %286 = vector.load %arg9[%285, %c0_79, %c0_80] : memref<7x8x128xf32, #tpu.memory_space<vmem>>, vector<1x8x128xf32>
    %287 = vector.shape_cast %286 : vector<1x8x128xf32> to vector<8x128xf32>
    %288 = vector.shape_cast %284 : vector<8x128xf32> to vector<1x8x128xf32>
    tpu.vector_store %arg9[%285, %c0_79, %c0_80], %288 {strides = array<i32>} : memref<7x8x128xf32, #tpu.memory_space<vmem>>, vector<1x8x128xf32>,
    %289 = tpu.iota {dimensions = array<i32: 1>} : vector<8x128xi32>
    %cst_81 = arith.constant dense<0xFF800000> : vector<8xf32>
    %290 = vector.multi_reduction <maximumf>, %284, %cst_81 [1] : vector<8x128xf32> to vector<8xf32>
    %291 = vector.shape_cast %290 : vector<8xf32> to vector<8x1xf32>
    %292 = vector.broadcast %291 : vector<8x1xf32> to vector<8x128xf32>
    %293 = arith.cmpf oeq, %284, %292 : vector<8x128xf32>
    %c128_i32 = arith.constant 128 : i32
    %294 = vector.broadcast %c128_i32 : i32 to vector<8x128xi32>
    %295 = arith.select %293, %289, %294 : vector<8x128xi1>, vector<8x128xi32>
    %cst_82 = arith.constant dense<2147483647> : vector<8xi32>
    %296 = vector.multi_reduction <minsi>, %295, %cst_82 [1] : vector<8x128xi32> to vector<8xi32>
    %297 = vector.shape_cast %296 : vector<8xi32> to vector<8x1xi32>
    %298 = vector.broadcast %297 : vector<8x1xi32> to vector<8x128xi32>
    %299 = arith.cmpi eq, %289, %298 : vector<8x128xi32>
    %300 = arith.extui %299 : vector<8x128xi1> to vector<8x128xi32>
    %301 = arith.sitofp %300 : vector<8x128xi32> to vector<8x128xf32>
    %c0_83 = arith.constant 0 : index
    %c0_84 = arith.constant 0 : index
    %302 = vector.load %arg5[%c0_83, %c0_84] : memref<128x128xf32, #tpu.memory_space<vmem>>, vector<128x128xf32>
    %cst_85 = arith.constant dense<0.000000e+00> : vector<8x128xf32>
    %303 = tpu.matmul %301, %302, %cst_85 {dimension_numbers = #tpu.dot_dimension_numbers<[1], [0], [0], [1], [0, 0, 1, 1], [], []>} : vector<8x128xf32>, vector<128x128xf32>, vector<8x128xf32> -> vector<8x128xf32>
    %304 = arith.index_cast %c0_i32_67 : i32 to index
    %305 = memref.load %arg1[%304] : memref<7xi32, #tpu.memory_space<smem>>
    %c0_i32_86 = arith.constant 0 : i32
    %306 = arith.cmpi sgt, %305, %c0_i32_86 : i32
    %c1_i32_87 = arith.constant 1 : i32
    %307 = arith.addi %c0_i32_67, %c1_i32_87 : i32
    %308 = arith.index_cast %307 : i32 to index
    %c0_88 = arith.constant 0 : index
    %c0_89 = arith.constant 0 : index
    %309 = vector.load %arg4[%308, %c0_88, %c0_89] : memref<8x8x128xf32, #tpu.memory_space<vmem>>, vector<1x8x128xf32>
    %310 = vector.shape_cast %309 : vector<1x8x128xf32> to vector<8x128xf32>
    %311 = arith.select %306, %310, %303 : vector<8x128xf32>
    %c1_i32_90 = arith.constant 1 : i32
    %c0_91 = arith.constant 0 : index
    %c0_92 = arith.constant 0 : index
    %312 = vector.load %arg6[%c0_91, %c0_92] : memref<32x128xf32, #tpu.memory_space<vmem>>, vector<32x128xf32>
    %cst_93 = arith.constant dense<0.000000e+00> : vector<8x128xf32>
    %313 = tpu.matmul %279, %312, %cst_93 {dimension_numbers = #tpu.dot_dimension_numbers<[1], [0], [0], [1], [0, 0, 1, 1], [], []>} : vector<8x32xf32>, vector<32x128xf32>, vector<8x128xf32> -> vector<8x128xf32>
    %314 = arith.addf %311, %313 : vector<8x128xf32>
    %315 = vector.extract_strided_slice %314 {offsets = [0, 0], sizes = [8, 32], strides = [1, 1]} : vector<8x128xf32> to vector<8x32xf32>
    %316 = arith.negf %315 : vector<8x32xf32>
    %317 = math.exp %316 : vector<8x32xf32>
    %cst_94 = arith.constant 1.000000e+00 : f32
    %318 = vector.broadcast %cst_94 : f32 to vector<8x32xf32>
    %319 = arith.addf %318, %317 : vector<8x32xf32>
    %320 = arith.divf %318, %319 : vector<8x32xf32>
    %321 = vector.extract_strided_slice %314 {offsets = [0, 32], sizes = [8, 32], strides = [1, 1]} : vector<8x128xf32> to vector<8x32xf32>
    %322 = arith.negf %321 : vector<8x32xf32>
    %323 = math.exp %322 : vector<8x32xf32>
    %cst_95 = arith.constant 1.000000e+00 : f32
    %324 = vector.broadcast %cst_95 : f32 to vector<8x32xf32>
    %325 = arith.addf %324, %323 : vector<8x32xf32>
    %326 = arith.divf %324, %325 : vector<8x32xf32>
    %327 = vector.extract_strided_slice %314 {offsets = [0, 64], sizes = [8, 32], strides = [1, 1]} : vector<8x128xf32> to vector<8x32xf32>
    %328 = math.tanh %327 : vector<8x32xf32>
    %329 = vector.extract_strided_slice %314 {offsets = [0, 96], sizes = [8, 32], strides = [1, 1]} : vector<8x128xf32> to vector<8x32xf32>
    %330 = arith.negf %329 : vector<8x32xf32>
    %331 = math.exp %330 : vector<8x32xf32>
    %cst_96 = arith.constant 1.000000e+00 : f32
    %332 = vector.broadcast %cst_96 : f32 to vector<8x32xf32>
    %333 = arith.addf %332, %331 : vector<8x32xf32>
    %334 = arith.divf %332, %333 : vector<8x32xf32>
    %335 = arith.mulf %326, %277 : vector<8x32xf32>
    %336 = arith.mulf %320, %328 : vector<8x32xf32>
    %337 = arith.addf %335, %336 : vector<8x32xf32>
    %338 = math.tanh %337 : vector<8x32xf32>
    %339 = arith.mulf %334, %338 : vector<8x32xf32>
    %c0_97 = arith.constant 0 : index
    %c0_98 = arith.constant 0 : index
    %340 = vector.load %arg7[%c0_97, %c0_98] : memref<32x128xf32, #tpu.memory_space<vmem>>, vector<32x128xf32>
    %cst_99 = arith.constant dense<0.000000e+00> : vector<8x128xf32>
    %341 = tpu.matmul %339, %340, %cst_99 {dimension_numbers = #tpu.dot_dimension_numbers<[1], [0], [0], [1], [0, 0, 1, 1], [], []>} : vector<8x32xf32>, vector<32x128xf32>, vector<8x128xf32> -> vector<8x128xf32>
    %c0_100 = arith.constant 0 : index
    %c0_101 = arith.constant 0 : index
    %342 = vector.load %arg8[%c0_100, %c0_101] : memref<1x128xf32, #tpu.memory_space<vmem>>, vector<1x128xf32>
    %343 = vector.broadcast %342 : vector<1x128xf32> to vector<8x128xf32>
    %344 = arith.addf %341, %343 : vector<8x128xf32>
    %345 = arith.index_cast %c1_i32_90 : i32 to index
    %c0_102 = arith.constant 0 : index
    %c0_103 = arith.constant 0 : index
    %346 = vector.load %arg9[%345, %c0_102, %c0_103] : memref<7x8x128xf32, #tpu.memory_space<vmem>>, vector<1x8x128xf32>
    %347 = vector.shape_cast %346 : vector<1x8x128xf32> to vector<8x128xf32>
    %348 = vector.shape_cast %344 : vector<8x128xf32> to vector<1x8x128xf32>
    tpu.vector_store %arg9[%345, %c0_102, %c0_103], %348 {strides = array<i32>} : memref<7x8x128xf32, #tpu.memory_space<vmem>>, vector<1x8x128xf32>,
    %349 = tpu.iota {dimensions = array<i32: 1>} : vector<8x128xi32>
    %cst_104 = arith.constant dense<0xFF800000> : vector<8xf32>
    %350 = vector.multi_reduction <maximumf>, %344, %cst_104 [1] : vector<8x128xf32> to vector<8xf32>
    %351 = vector.shape_cast %350 : vector<8xf32> to vector<8x1xf32>
    %352 = vector.broadcast %351 : vector<8x1xf32> to vector<8x128xf32>
    %353 = arith.cmpf oeq, %344, %352 : vector<8x128xf32>
    %c128_i32_105 = arith.constant 128 : i32
    %354 = vector.broadcast %c128_i32_105 : i32 to vector<8x128xi32>
    %355 = arith.select %353, %349, %354 : vector<8x128xi1>, vector<8x128xi32>
    %cst_106 = arith.constant dense<2147483647> : vector<8xi32>
    %356 = vector.multi_reduction <minsi>, %355, %cst_106 [1] : vector<8x128xi32> to vector<8xi32>
    %357 = vector.shape_cast %356 : vector<8xi32> to vector<8x1xi32>
    %358 = vector.broadcast %357 : vector<8x1xi32> to vector<8x128xi32>
    %359 = arith.cmpi eq, %349, %358 : vector<8x128xi32>
    %360 = arith.extui %359 : vector<8x128xi1> to vector<8x128xi32>
    %361 = arith.sitofp %360 : vector<8x128xi32> to vector<8x128xf32>
    %c0_107 = arith.constant 0 : index
    %c0_108 = arith.constant 0 : index
    %362 = vector.load %arg5[%c0_107, %c0_108] : memref<128x128xf32, #tpu.memory_space<vmem>>, vector<128x128xf32>
    %cst_109 = arith.constant dense<0.000000e+00> : vector<8x128xf32>
    %363 = tpu.matmul %361, %362, %cst_109 {dimension_numbers = #tpu.dot_dimension_numbers<[1], [0], [0], [1], [0, 0, 1, 1], [], []>} : vector<8x128xf32>, vector<128x128xf32>, vector<8x128xf32> -> vector<8x128xf32>
    %364 = arith.index_cast %c1_i32_90 : i32 to index
    %365 = memref.load %arg1[%364] : memref<7xi32, #tpu.memory_space<smem>>
    %c0_i32_110 = arith.constant 0 : i32
    %366 = arith.cmpi sgt, %365, %c0_i32_110 : i32
    %c1_i32_111 = arith.constant 1 : i32
    %367 = arith.addi %c1_i32_90, %c1_i32_111 : i32
    %368 = arith.index_cast %367 : i32 to index
    %c0_112 = arith.constant 0 : index
    %c0_113 = arith.constant 0 : index
    %369 = vector.load %arg4[%368, %c0_112, %c0_113] : memref<8x8x128xf32, #tpu.memory_space<vmem>>, vector<1x8x128xf32>
    %370 = vector.shape_cast %369 : vector<1x8x128xf32> to vector<8x128xf32>
    %371 = arith.select %366, %370, %363 : vector<8x128xf32>
    %c2_i32_114 = arith.constant 2 : i32
    %c0_115 = arith.constant 0 : index
    %c0_116 = arith.constant 0 : index
    %372 = vector.load %arg6[%c0_115, %c0_116] : memref<32x128xf32, #tpu.memory_space<vmem>>, vector<32x128xf32>
    %cst_117 = arith.constant dense<0.000000e+00> : vector<8x128xf32>
    %373 = tpu.matmul %339, %372, %cst_117 {dimension_numbers = #tpu.dot_dimension_numbers<[1], [0], [0], [1], [0, 0, 1, 1], [], []>} : vector<8x32xf32>, vector<32x128xf32>, vector<8x128xf32> -> vector<8x128xf32>
    %374 = arith.addf %371, %373 : vector<8x128xf32>
    %375 = vector.extract_strided_slice %374 {offsets = [0, 0], sizes = [8, 32], strides = [1, 1]} : vector<8x128xf32> to vector<8x32xf32>
    %376 = arith.negf %375 : vector<8x32xf32>
    %377 = math.exp %376 : vector<8x32xf32>
    %cst_118 = arith.constant 1.000000e+00 : f32
    %378 = vector.broadcast %cst_118 : f32 to vector<8x32xf32>
    %379 = arith.addf %378, %377 : vector<8x32xf32>
    %380 = arith.divf %378, %379 : vector<8x32xf32>
    %381 = vector.extract_strided_slice %374 {offsets = [0, 32], sizes = [8, 32], strides = [1, 1]} : vector<8x128xf32> to vector<8x32xf32>
    %382 = arith.negf %381 : vector<8x32xf32>
    %383 = math.exp %382 : vector<8x32xf32>
    %cst_119 = arith.constant 1.000000e+00 : f32
    %384 = vector.broadcast %cst_119 : f32 to vector<8x32xf32>
    %385 = arith.addf %384, %383 : vector<8x32xf32>
    %386 = arith.divf %384, %385 : vector<8x32xf32>
    %387 = vector.extract_strided_slice %374 {offsets = [0, 64], sizes = [8, 32], strides = [1, 1]} : vector<8x128xf32> to vector<8x32xf32>
    %388 = math.tanh %387 : vector<8x32xf32>
    %389 = vector.extract_strided_slice %374 {offsets = [0, 96], sizes = [8, 32], strides = [1, 1]} : vector<8x128xf32> to vector<8x32xf32>
    %390 = arith.negf %389 : vector<8x32xf32>
    %391 = math.exp %390 : vector<8x32xf32>
    %cst_120 = arith.constant 1.000000e+00 : f32
    %392 = vector.broadcast %cst_120 : f32 to vector<8x32xf32>
    %393 = arith.addf %392, %391 : vector<8x32xf32>
    %394 = arith.divf %392, %393 : vector<8x32xf32>
    %395 = arith.mulf %386, %337 : vector<8x32xf32>
    %396 = arith.mulf %380, %388 : vector<8x32xf32>
    %397 = arith.addf %395, %396 : vector<8x32xf32>
    %398 = math.tanh %397 : vector<8x32xf32>
    %399 = arith.mulf %394, %398 : vector<8x32xf32>
    %c0_121 = arith.constant 0 : index
    %c0_122 = arith.constant 0 : index
    %400 = vector.load %arg7[%c0_121, %c0_122] : memref<32x128xf32, #tpu.memory_space<vmem>>, vector<32x128xf32>
    %cst_123 = arith.constant dense<0.000000e+00> : vector<8x128xf32>
    %401 = tpu.matmul %399, %400, %cst_123 {dimension_numbers = #tpu.dot_dimension_numbers<[1], [0], [0], [1], [0, 0, 1, 1], [], []>} : vector<8x32xf32>, vector<32x128xf32>, vector<8x128xf32> -> vector<8x128xf32>
    %c0_124 = arith.constant 0 : index
    %c0_125 = arith.constant 0 : index
    %402 = vector.load %arg8[%c0_124, %c0_125] : memref<1x128xf32, #tpu.memory_space<vmem>>, vector<1x128xf32>
    %403 = vector.broadcast %402 : vector<1x128xf32> to vector<8x128xf32>
    %404 = arith.addf %401, %403 : vector<8x128xf32>
    %405 = arith.index_cast %c2_i32_114 : i32 to index
    %c0_126 = arith.constant 0 : index
    %c0_127 = arith.constant 0 : index
    %406 = vector.load %arg9[%405, %c0_126, %c0_127] : memref<7x8x128xf32, #tpu.memory_space<vmem>>, vector<1x8x128xf32>
    %407 = vector.shape_cast %406 : vector<1x8x128xf32> to vector<8x128xf32>
    %408 = vector.shape_cast %404 : vector<8x128xf32> to vector<1x8x128xf32>
    tpu.vector_store %arg9[%405, %c0_126, %c0_127], %408 {strides = array<i32>} : memref<7x8x128xf32, #tpu.memory_space<vmem>>, vector<1x8x128xf32>,
    %409 = tpu.iota {dimensions = array<i32: 1>} : vector<8x128xi32>
    %cst_128 = arith.constant dense<0xFF800000> : vector<8xf32>
    %410 = vector.multi_reduction <maximumf>, %404, %cst_128 [1] : vector<8x128xf32> to vector<8xf32>
    %411 = vector.shape_cast %410 : vector<8xf32> to vector<8x1xf32>
    %412 = vector.broadcast %411 : vector<8x1xf32> to vector<8x128xf32>
    %413 = arith.cmpf oeq, %404, %412 : vector<8x128xf32>
    %c128_i32_129 = arith.constant 128 : i32
    %414 = vector.broadcast %c128_i32_129 : i32 to vector<8x128xi32>
    %415 = arith.select %413, %409, %414 : vector<8x128xi1>, vector<8x128xi32>
    %cst_130 = arith.constant dense<2147483647> : vector<8xi32>
    %416 = vector.multi_reduction <minsi>, %415, %cst_130 [1] : vector<8x128xi32> to vector<8xi32>
    %417 = vector.shape_cast %416 : vector<8xi32> to vector<8x1xi32>
    %418 = vector.broadcast %417 : vector<8x1xi32> to vector<8x128xi32>
    %419 = arith.cmpi eq, %409, %418 : vector<8x128xi32>
    %420 = arith.extui %419 : vector<8x128xi1> to vector<8x128xi32>
    %421 = arith.sitofp %420 : vector<8x128xi32> to vector<8x128xf32>
    %c0_131 = arith.constant 0 : index
    %c0_132 = arith.constant 0 : index
    %422 = vector.load %arg5[%c0_131, %c0_132] : memref<128x128xf32, #tpu.memory_space<vmem>>, vector<128x128xf32>
    %cst_133 = arith.constant dense<0.000000e+00> : vector<8x128xf32>
    %423 = tpu.matmul %421, %422, %cst_133 {dimension_numbers = #tpu.dot_dimension_numbers<[1], [0], [0], [1], [0, 0, 1, 1], [], []>} : vector<8x128xf32>, vector<128x128xf32>, vector<8x128xf32> -> vector<8x128xf32>
    %424 = arith.index_cast %c2_i32_114 : i32 to index
    %425 = memref.load %arg1[%424] : memref<7xi32, #tpu.memory_space<smem>>
    %c0_i32_134 = arith.constant 0 : i32
    %426 = arith.cmpi sgt, %425, %c0_i32_134 : i32
    %c1_i32_135 = arith.constant 1 : i32
    %427 = arith.addi %c2_i32_114, %c1_i32_135 : i32
    %428 = arith.index_cast %427 : i32 to index
    %c0_136 = arith.constant 0 : index
    %c0_137 = arith.constant 0 : index
    %429 = vector.load %arg4[%428, %c0_136, %c0_137] : memref<8x8x128xf32, #tpu.memory_space<vmem>>, vector<1x8x128xf32>
    %430 = vector.shape_cast %429 : vector<1x8x128xf32> to vector<8x128xf32>
    %431 = arith.select %426, %430, %423 : vector<8x128xf32>
    %c3_i32_138 = arith.constant 3 : i32
    %c0_139 = arith.constant 0 : index
    %c0_140 = arith.constant 0 : index
    %432 = vector.load %arg6[%c0_139, %c0_140] : memref<32x128xf32, #tpu.memory_space<vmem>>, vector<32x128xf32>
    %cst_141 = arith.constant dense<0.000000e+00> : vector<8x128xf32>
    %433 = tpu.matmul %399, %432, %cst_141 {dimension_numbers = #tpu.dot_dimension_numbers<[1], [0], [0], [1], [0, 0, 1, 1], [], []>} : vector<8x32xf32>, vector<32x128xf32>, vector<8x128xf32> -> vector<8x128xf32>
    %434 = arith.addf %431, %433 : vector<8x128xf32>
    %435 = vector.extract_strided_slice %434 {offsets = [0, 0], sizes = [8, 32], strides = [1, 1]} : vector<8x128xf32> to vector<8x32xf32>
    %436 = arith.negf %435 : vector<8x32xf32>
    %437 = math.exp %436 : vector<8x32xf32>
    %cst_142 = arith.constant 1.000000e+00 : f32
    %438 = vector.broadcast %cst_142 : f32 to vector<8x32xf32>
    %439 = arith.addf %438, %437 : vector<8x32xf32>
    %440 = arith.divf %438, %439 : vector<8x32xf32>
    %441 = vector.extract_strided_slice %434 {offsets = [0, 32], sizes = [8, 32], strides = [1, 1]} : vector<8x128xf32> to vector<8x32xf32>
    %442 = arith.negf %441 : vector<8x32xf32>
    %443 = math.exp %442 : vector<8x32xf32>
    %cst_143 = arith.constant 1.000000e+00 : f32
    %444 = vector.broadcast %cst_143 : f32 to vector<8x32xf32>
    %445 = arith.addf %444, %443 : vector<8x32xf32>
    %446 = arith.divf %444, %445 : vector<8x32xf32>
    %447 = vector.extract_strided_slice %434 {offsets = [0, 64], sizes = [8, 32], strides = [1, 1]} : vector<8x128xf32> to vector<8x32xf32>
    %448 = math.tanh %447 : vector<8x32xf32>
    %449 = vector.extract_strided_slice %434 {offsets = [0, 96], sizes = [8, 32], strides = [1, 1]} : vector<8x128xf32> to vector<8x32xf32>
    %450 = arith.negf %449 : vector<8x32xf32>
    %451 = math.exp %450 : vector<8x32xf32>
    %cst_144 = arith.constant 1.000000e+00 : f32
    %452 = vector.broadcast %cst_144 : f32 to vector<8x32xf32>
    %453 = arith.addf %452, %451 : vector<8x32xf32>
    %454 = arith.divf %452, %453 : vector<8x32xf32>
    %455 = arith.mulf %446, %397 : vector<8x32xf32>
    %456 = arith.mulf %440, %448 : vector<8x32xf32>
    %457 = arith.addf %455, %456 : vector<8x32xf32>
    %458 = math.tanh %457 : vector<8x32xf32>
    %459 = arith.mulf %454, %458 : vector<8x32xf32>
    %c0_145 = arith.constant 0 : index
    %c0_146 = arith.constant 0 : index
    %460 = vector.load %arg7[%c0_145, %c0_146] : memref<32x128xf32, #tpu.memory_space<vmem>>, vector<32x128xf32>
    %cst_147 = arith.constant dense<0.000000e+00> : vector<8x128xf32>
    %461 = tpu.matmul %459, %460, %cst_147 {dimension_numbers = #tpu.dot_dimension_numbers<[1], [0], [0], [1], [0, 0, 1, 1], [], []>} : vector<8x32xf32>, vector<32x128xf32>, vector<8x128xf32> -> vector<8x128xf32>
    %c0_148 = arith.constant 0 : index
    %c0_149 = arith.constant 0 : index
    %462 = vector.load %arg8[%c0_148, %c0_149] : memref<1x128xf32, #tpu.memory_space<vmem>>, vector<1x128xf32>
    %463 = vector.broadcast %462 : vector<1x128xf32> to vector<8x128xf32>
    %464 = arith.addf %461, %463 : vector<8x128xf32>
    %465 = arith.index_cast %c3_i32_138 : i32 to index
    %c0_150 = arith.constant 0 : index
    %c0_151 = arith.constant 0 : index
    %466 = vector.load %arg9[%465, %c0_150, %c0_151] : memref<7x8x128xf32, #tpu.memory_space<vmem>>, vector<1x8x128xf32>
    %467 = vector.shape_cast %466 : vector<1x8x128xf32> to vector<8x128xf32>
    %468 = vector.shape_cast %464 : vector<8x128xf32> to vector<1x8x128xf32>
    tpu.vector_store %arg9[%465, %c0_150, %c0_151], %468 {strides = array<i32>} : memref<7x8x128xf32, #tpu.memory_space<vmem>>, vector<1x8x128xf32>,
    %469 = tpu.iota {dimensions = array<i32: 1>} : vector<8x128xi32>
    %cst_152 = arith.constant dense<0xFF800000> : vector<8xf32>
    %470 = vector.multi_reduction <maximumf>, %464, %cst_152 [1] : vector<8x128xf32> to vector<8xf32>
    %471 = vector.shape_cast %470 : vector<8xf32> to vector<8x1xf32>
    %472 = vector.broadcast %471 : vector<8x1xf32> to vector<8x128xf32>
    %473 = arith.cmpf oeq, %464, %472 : vector<8x128xf32>
    %c128_i32_153 = arith.constant 128 : i32
    %474 = vector.broadcast %c128_i32_153 : i32 to vector<8x128xi32>
    %475 = arith.select %473, %469, %474 : vector<8x128xi1>, vector<8x128xi32>
    %cst_154 = arith.constant dense<2147483647> : vector<8xi32>
    %476 = vector.multi_reduction <minsi>, %475, %cst_154 [1] : vector<8x128xi32> to vector<8xi32>
    %477 = vector.shape_cast %476 : vector<8xi32> to vector<8x1xi32>
    %478 = vector.broadcast %477 : vector<8x1xi32> to vector<8x128xi32>
    %479 = arith.cmpi eq, %469, %478 : vector<8x128xi32>
    %480 = arith.extui %479 : vector<8x128xi1> to vector<8x128xi32>
    %481 = arith.sitofp %480 : vector<8x128xi32> to vector<8x128xf32>
    %c0_155 = arith.constant 0 : index
    %c0_156 = arith.constant 0 : index
    %482 = vector.load %arg5[%c0_155, %c0_156] : memref<128x128xf32, #tpu.memory_space<vmem>>, vector<128x128xf32>
    %cst_157 = arith.constant dense<0.000000e+00> : vector<8x128xf32>
    %483 = tpu.matmul %481, %482, %cst_157 {dimension_numbers = #tpu.dot_dimension_numbers<[1], [0], [0], [1], [0, 0, 1, 1], [], []>} : vector<8x128xf32>, vector<128x128xf32>, vector<8x128xf32> -> vector<8x128xf32>
    %484 = arith.index_cast %c3_i32_138 : i32 to index
    %485 = memref.load %arg1[%484] : memref<7xi32, #tpu.memory_space<smem>>
    %c0_i32_158 = arith.constant 0 : i32
    %486 = arith.cmpi sgt, %485, %c0_i32_158 : i32
    %c1_i32_159 = arith.constant 1 : i32
    %487 = arith.addi %c3_i32_138, %c1_i32_159 : i32
    %488 = arith.index_cast %487 : i32 to index
    %c0_160 = arith.constant 0 : index
    %c0_161 = arith.constant 0 : index
    %489 = vector.load %arg4[%488, %c0_160, %c0_161] : memref<8x8x128xf32, #tpu.memory_space<vmem>>, vector<1x8x128xf32>
    %490 = vector.shape_cast %489 : vector<1x8x128xf32> to vector<8x128xf32>
    %491 = arith.select %486, %490, %483 : vector<8x128xf32>
    %c4_i32_162 = arith.constant 4 : i32
    %c0_163 = arith.constant 0 : index
    %c0_164 = arith.constant 0 : index
    %492 = vector.load %arg6[%c0_163, %c0_164] : memref<32x128xf32, #tpu.memory_space<vmem>>, vector<32x128xf32>
    %cst_165 = arith.constant dense<0.000000e+00> : vector<8x128xf32>
    %493 = tpu.matmul %459, %492, %cst_165 {dimension_numbers = #tpu.dot_dimension_numbers<[1], [0], [0], [1], [0, 0, 1, 1], [], []>} : vector<8x32xf32>, vector<32x128xf32>, vector<8x128xf32> -> vector<8x128xf32>
    %494 = arith.addf %491, %493 : vector<8x128xf32>
    %495 = vector.extract_strided_slice %494 {offsets = [0, 0], sizes = [8, 32], strides = [1, 1]} : vector<8x128xf32> to vector<8x32xf32>
    %496 = arith.negf %495 : vector<8x32xf32>
    %497 = math.exp %496 : vector<8x32xf32>
    %cst_166 = arith.constant 1.000000e+00 : f32
    %498 = vector.broadcast %cst_166 : f32 to vector<8x32xf32>
    %499 = arith.addf %498, %497 : vector<8x32xf32>
    %500 = arith.divf %498, %499 : vector<8x32xf32>
    %501 = vector.extract_strided_slice %494 {offsets = [0, 32], sizes = [8, 32], strides = [1, 1]} : vector<8x128xf32> to vector<8x32xf32>
    %502 = arith.negf %501 : vector<8x32xf32>
    %503 = math.exp %502 : vector<8x32xf32>
    %cst_167 = arith.constant 1.000000e+00 : f32
    %504 = vector.broadcast %cst_167 : f32 to vector<8x32xf32>
    %505 = arith.addf %504, %503 : vector<8x32xf32>
    %506 = arith.divf %504, %505 : vector<8x32xf32>
    %507 = vector.extract_strided_slice %494 {offsets = [0, 64], sizes = [8, 32], strides = [1, 1]} : vector<8x128xf32> to vector<8x32xf32>
    %508 = math.tanh %507 : vector<8x32xf32>
    %509 = vector.extract_strided_slice %494 {offsets = [0, 96], sizes = [8, 32], strides = [1, 1]} : vector<8x128xf32> to vector<8x32xf32>
    %510 = arith.negf %509 : vector<8x32xf32>
    %511 = math.exp %510 : vector<8x32xf32>
    %cst_168 = arith.constant 1.000000e+00 : f32
    %512 = vector.broadcast %cst_168 : f32 to vector<8x32xf32>
    %513 = arith.addf %512, %511 : vector<8x32xf32>
    %514 = arith.divf %512, %513 : vector<8x32xf32>
    %515 = arith.mulf %506, %457 : vector<8x32xf32>
    %516 = arith.mulf %500, %508 : vector<8x32xf32>
    %517 = arith.addf %515, %516 : vector<8x32xf32>
    %518 = math.tanh %517 : vector<8x32xf32>
    %519 = arith.mulf %514, %518 : vector<8x32xf32>
    %c0_169 = arith.constant 0 : index
    %c0_170 = arith.constant 0 : index
    %520 = vector.load %arg7[%c0_169, %c0_170] : memref<32x128xf32, #tpu.memory_space<vmem>>, vector<32x128xf32>
    %cst_171 = arith.constant dense<0.000000e+00> : vector<8x128xf32>
    %521 = tpu.matmul %519, %520, %cst_171 {dimension_numbers = #tpu.dot_dimension_numbers<[1], [0], [0], [1], [0, 0, 1, 1], [], []>} : vector<8x32xf32>, vector<32x128xf32>, vector<8x128xf32> -> vector<8x128xf32>
    %c0_172 = arith.constant 0 : index
    %c0_173 = arith.constant 0 : index
    %522 = vector.load %arg8[%c0_172, %c0_173] : memref<1x128xf32, #tpu.memory_space<vmem>>, vector<1x128xf32>
    %523 = vector.broadcast %522 : vector<1x128xf32> to vector<8x128xf32>
    %524 = arith.addf %521, %523 : vector<8x128xf32>
    %525 = arith.index_cast %c4_i32_162 : i32 to index
    %c0_174 = arith.constant 0 : index
    %c0_175 = arith.constant 0 : index
    %526 = vector.load %arg9[%525, %c0_174, %c0_175] : memref<7x8x128xf32, #tpu.memory_space<vmem>>, vector<1x8x128xf32>
    %527 = vector.shape_cast %526 : vector<1x8x128xf32> to vector<8x128xf32>
    %528 = vector.shape_cast %524 : vector<8x128xf32> to vector<1x8x128xf32>
    tpu.vector_store %arg9[%525, %c0_174, %c0_175], %528 {strides = array<i32>} : memref<7x8x128xf32, #tpu.memory_space<vmem>>, vector<1x8x128xf32>,
    %529 = tpu.iota {dimensions = array<i32: 1>} : vector<8x128xi32>
    %cst_176 = arith.constant dense<0xFF800000> : vector<8xf32>
    %530 = vector.multi_reduction <maximumf>, %524, %cst_176 [1] : vector<8x128xf32> to vector<8xf32>
    %531 = vector.shape_cast %530 : vector<8xf32> to vector<8x1xf32>
    %532 = vector.broadcast %531 : vector<8x1xf32> to vector<8x128xf32>
    %533 = arith.cmpf oeq, %524, %532 : vector<8x128xf32>
    %c128_i32_177 = arith.constant 128 : i32
    %534 = vector.broadcast %c128_i32_177 : i32 to vector<8x128xi32>
    %535 = arith.select %533, %529, %534 : vector<8x128xi1>, vector<8x128xi32>
    %cst_178 = arith.constant dense<2147483647> : vector<8xi32>
    %536 = vector.multi_reduction <minsi>, %535, %cst_178 [1] : vector<8x128xi32> to vector<8xi32>
    %537 = vector.shape_cast %536 : vector<8xi32> to vector<8x1xi32>
    %538 = vector.broadcast %537 : vector<8x1xi32> to vector<8x128xi32>
    %539 = arith.cmpi eq, %529, %538 : vector<8x128xi32>
    %540 = arith.extui %539 : vector<8x128xi1> to vector<8x128xi32>
    %541 = arith.sitofp %540 : vector<8x128xi32> to vector<8x128xf32>
    %c0_179 = arith.constant 0 : index
    %c0_180 = arith.constant 0 : index
    %542 = vector.load %arg5[%c0_179, %c0_180] : memref<128x128xf32, #tpu.memory_space<vmem>>, vector<128x128xf32>
    %cst_181 = arith.constant dense<0.000000e+00> : vector<8x128xf32>
    %543 = tpu.matmul %541, %542, %cst_181 {dimension_numbers = #tpu.dot_dimension_numbers<[1], [0], [0], [1], [0, 0, 1, 1], [], []>} : vector<8x128xf32>, vector<128x128xf32>, vector<8x128xf32> -> vector<8x128xf32>
    %544 = arith.index_cast %c4_i32_162 : i32 to index
    %545 = memref.load %arg1[%544] : memref<7xi32, #tpu.memory_space<smem>>
    %c0_i32_182 = arith.constant 0 : i32
    %546 = arith.cmpi sgt, %545, %c0_i32_182 : i32
    %c1_i32_183 = arith.constant 1 : i32
    %547 = arith.addi %c4_i32_162, %c1_i32_183 : i32
    %548 = arith.index_cast %547 : i32 to index
    %c0_184 = arith.constant 0 : index
    %c0_185 = arith.constant 0 : index
    %549 = vector.load %arg4[%548, %c0_184, %c0_185] : memref<8x8x128xf32, #tpu.memory_space<vmem>>, vector<1x8x128xf32>
    %550 = vector.shape_cast %549 : vector<1x8x128xf32> to vector<8x128xf32>
    %551 = arith.select %546, %550, %543 : vector<8x128xf32>
    %c5_i32_186 = arith.constant 5 : i32
    %c0_187 = arith.constant 0 : index
    %c0_188 = arith.constant 0 : index
    %552 = vector.load %arg6[%c0_187, %c0_188] : memref<32x128xf32, #tpu.memory_space<vmem>>, vector<32x128xf32>
    %cst_189 = arith.constant dense<0.000000e+00> : vector<8x128xf32>
    %553 = tpu.matmul %519, %552, %cst_189 {dimension_numbers = #tpu.dot_dimension_numbers<[1], [0], [0], [1], [0, 0, 1, 1], [], []>} : vector<8x32xf32>, vector<32x128xf32>, vector<8x128xf32> -> vector<8x128xf32>
    %554 = arith.addf %551, %553 : vector<8x128xf32>
    %555 = vector.extract_strided_slice %554 {offsets = [0, 0], sizes = [8, 32], strides = [1, 1]} : vector<8x128xf32> to vector<8x32xf32>
    %556 = arith.negf %555 : vector<8x32xf32>
    %557 = math.exp %556 : vector<8x32xf32>
    %cst_190 = arith.constant 1.000000e+00 : f32
    %558 = vector.broadcast %cst_190 : f32 to vector<8x32xf32>
    %559 = arith.addf %558, %557 : vector<8x32xf32>
    %560 = arith.divf %558, %559 : vector<8x32xf32>
    %561 = vector.extract_strided_slice %554 {offsets = [0, 32], sizes = [8, 32], strides = [1, 1]} : vector<8x128xf32> to vector<8x32xf32>
    %562 = arith.negf %561 : vector<8x32xf32>
    %563 = math.exp %562 : vector<8x32xf32>
    %cst_191 = arith.constant 1.000000e+00 : f32
    %564 = vector.broadcast %cst_191 : f32 to vector<8x32xf32>
    %565 = arith.addf %564, %563 : vector<8x32xf32>
    %566 = arith.divf %564, %565 : vector<8x32xf32>
    %567 = vector.extract_strided_slice %554 {offsets = [0, 64], sizes = [8, 32], strides = [1, 1]} : vector<8x128xf32> to vector<8x32xf32>
    %568 = math.tanh %567 : vector<8x32xf32>
    %569 = vector.extract_strided_slice %554 {offsets = [0, 96], sizes = [8, 32], strides = [1, 1]} : vector<8x128xf32> to vector<8x32xf32>
    %570 = arith.negf %569 : vector<8x32xf32>
    %571 = math.exp %570 : vector<8x32xf32>
    %cst_192 = arith.constant 1.000000e+00 : f32
    %572 = vector.broadcast %cst_192 : f32 to vector<8x32xf32>
    %573 = arith.addf %572, %571 : vector<8x32xf32>
    %574 = arith.divf %572, %573 : vector<8x32xf32>
    %575 = arith.mulf %566, %517 : vector<8x32xf32>
    %576 = arith.mulf %560, %568 : vector<8x32xf32>
    %577 = arith.addf %575, %576 : vector<8x32xf32>
    %578 = math.tanh %577 : vector<8x32xf32>
    %579 = arith.mulf %574, %578 : vector<8x32xf32>
    %c0_193 = arith.constant 0 : index
    %c0_194 = arith.constant 0 : index
    %580 = vector.load %arg7[%c0_193, %c0_194] : memref<32x128xf32, #tpu.memory_space<vmem>>, vector<32x128xf32>
    %cst_195 = arith.constant dense<0.000000e+00> : vector<8x128xf32>
    %581 = tpu.matmul %579, %580, %cst_195 {dimension_numbers = #tpu.dot_dimension_numbers<[1], [0], [0], [1], [0, 0, 1, 1], [], []>} : vector<8x32xf32>, vector<32x128xf32>, vector<8x128xf32> -> vector<8x128xf32>
    %c0_196 = arith.constant 0 : index
    %c0_197 = arith.constant 0 : index
    %582 = vector.load %arg8[%c0_196, %c0_197] : memref<1x128xf32, #tpu.memory_space<vmem>>, vector<1x128xf32>
    %583 = vector.broadcast %582 : vector<1x128xf32> to vector<8x128xf32>
    %584 = arith.addf %581, %583 : vector<8x128xf32>
    %585 = arith.index_cast %c5_i32_186 : i32 to index
    %c0_198 = arith.constant 0 : index
    %c0_199 = arith.constant 0 : index
    %586 = vector.load %arg9[%585, %c0_198, %c0_199] : memref<7x8x128xf32, #tpu.memory_space<vmem>>, vector<1x8x128xf32>
    %587 = vector.shape_cast %586 : vector<1x8x128xf32> to vector<8x128xf32>
    %588 = vector.shape_cast %584 : vector<8x128xf32> to vector<1x8x128xf32>
    tpu.vector_store %arg9[%585, %c0_198, %c0_199], %588 {strides = array<i32>} : memref<7x8x128xf32, #tpu.memory_space<vmem>>, vector<1x8x128xf32>,
    %589 = tpu.iota {dimensions = array<i32: 1>} : vector<8x128xi32>
    %cst_200 = arith.constant dense<0xFF800000> : vector<8xf32>
    %590 = vector.multi_reduction <maximumf>, %584, %cst_200 [1] : vector<8x128xf32> to vector<8xf32>
    %591 = vector.shape_cast %590 : vector<8xf32> to vector<8x1xf32>
    %592 = vector.broadcast %591 : vector<8x1xf32> to vector<8x128xf32>
    %593 = arith.cmpf oeq, %584, %592 : vector<8x128xf32>
    %c128_i32_201 = arith.constant 128 : i32
    %594 = vector.broadcast %c128_i32_201 : i32 to vector<8x128xi32>
    %595 = arith.select %593, %589, %594 : vector<8x128xi1>, vector<8x128xi32>
    %cst_202 = arith.constant dense<2147483647> : vector<8xi32>
    %596 = vector.multi_reduction <minsi>, %595, %cst_202 [1] : vector<8x128xi32> to vector<8xi32>
    %597 = vector.shape_cast %596 : vector<8xi32> to vector<8x1xi32>
    %598 = vector.broadcast %597 : vector<8x1xi32> to vector<8x128xi32>
    %599 = arith.cmpi eq, %589, %598 : vector<8x128xi32>
    %600 = arith.extui %599 : vector<8x128xi1> to vector<8x128xi32>
    %601 = arith.sitofp %600 : vector<8x128xi32> to vector<8x128xf32>
    %c0_203 = arith.constant 0 : index
    %c0_204 = arith.constant 0 : index
    %602 = vector.load %arg5[%c0_203, %c0_204] : memref<128x128xf32, #tpu.memory_space<vmem>>, vector<128x128xf32>
    %cst_205 = arith.constant dense<0.000000e+00> : vector<8x128xf32>
    %603 = tpu.matmul %601, %602, %cst_205 {dimension_numbers = #tpu.dot_dimension_numbers<[1], [0], [0], [1], [0, 0, 1, 1], [], []>} : vector<8x128xf32>, vector<128x128xf32>, vector<8x128xf32> -> vector<8x128xf32>
    %604 = arith.index_cast %c5_i32_186 : i32 to index
    %605 = memref.load %arg1[%604] : memref<7xi32, #tpu.memory_space<smem>>
    %c0_i32_206 = arith.constant 0 : i32
    %606 = arith.cmpi sgt, %605, %c0_i32_206 : i32
    %c1_i32_207 = arith.constant 1 : i32
    %607 = arith.addi %c5_i32_186, %c1_i32_207 : i32
    %608 = arith.index_cast %607 : i32 to index
    %c0_208 = arith.constant 0 : index
    %c0_209 = arith.constant 0 : index
    %609 = vector.load %arg4[%608, %c0_208, %c0_209] : memref<8x8x128xf32, #tpu.memory_space<vmem>>, vector<1x8x128xf32>
    %610 = vector.shape_cast %609 : vector<1x8x128xf32> to vector<8x128xf32>
    %611 = arith.select %606, %610, %603 : vector<8x128xf32>
    %c6_i32_210 = arith.constant 6 : i32
    %c0_211 = arith.constant 0 : index
    %c0_212 = arith.constant 0 : index
    %612 = vector.load %arg6[%c0_211, %c0_212] : memref<32x128xf32, #tpu.memory_space<vmem>>, vector<32x128xf32>
    %cst_213 = arith.constant dense<0.000000e+00> : vector<8x128xf32>
    %613 = tpu.matmul %579, %612, %cst_213 {dimension_numbers = #tpu.dot_dimension_numbers<[1], [0], [0], [1], [0, 0, 1, 1], [], []>} : vector<8x32xf32>, vector<32x128xf32>, vector<8x128xf32> -> vector<8x128xf32>
    %614 = arith.addf %611, %613 : vector<8x128xf32>
    %615 = vector.extract_strided_slice %614 {offsets = [0, 0], sizes = [8, 32], strides = [1, 1]} : vector<8x128xf32> to vector<8x32xf32>
    %616 = arith.negf %615 : vector<8x32xf32>
    %617 = math.exp %616 : vector<8x32xf32>
    %cst_214 = arith.constant 1.000000e+00 : f32
    %618 = vector.broadcast %cst_214 : f32 to vector<8x32xf32>
    %619 = arith.addf %618, %617 : vector<8x32xf32>
    %620 = arith.divf %618, %619 : vector<8x32xf32>
    %621 = vector.extract_strided_slice %614 {offsets = [0, 32], sizes = [8, 32], strides = [1, 1]} : vector<8x128xf32> to vector<8x32xf32>
    %622 = arith.negf %621 : vector<8x32xf32>
    %623 = math.exp %622 : vector<8x32xf32>
    %cst_215 = arith.constant 1.000000e+00 : f32
    %624 = vector.broadcast %cst_215 : f32 to vector<8x32xf32>
    %625 = arith.addf %624, %623 : vector<8x32xf32>
    %626 = arith.divf %624, %625 : vector<8x32xf32>
    %627 = vector.extract_strided_slice %614 {offsets = [0, 64], sizes = [8, 32], strides = [1, 1]} : vector<8x128xf32> to vector<8x32xf32>
    %628 = math.tanh %627 : vector<8x32xf32>
    %629 = vector.extract_strided_slice %614 {offsets = [0, 96], sizes = [8, 32], strides = [1, 1]} : vector<8x128xf32> to vector<8x32xf32>
    %630 = arith.negf %629 : vector<8x32xf32>
    %631 = math.exp %630 : vector<8x32xf32>
    %cst_216 = arith.constant 1.000000e+00 : f32
    %632 = vector.broadcast %cst_216 : f32 to vector<8x32xf32>
    %633 = arith.addf %632, %631 : vector<8x32xf32>
    %634 = arith.divf %632, %633 : vector<8x32xf32>
    %635 = arith.mulf %626, %577 : vector<8x32xf32>
    %636 = arith.mulf %620, %628 : vector<8x32xf32>
    %637 = arith.addf %635, %636 : vector<8x32xf32>
    %638 = math.tanh %637 : vector<8x32xf32>
    %639 = arith.mulf %634, %638 : vector<8x32xf32>
    %c0_217 = arith.constant 0 : index
    %c0_218 = arith.constant 0 : index
    %640 = vector.load %arg7[%c0_217, %c0_218] : memref<32x128xf32, #tpu.memory_space<vmem>>, vector<32x128xf32>
    %cst_219 = arith.constant dense<0.000000e+00> : vector<8x128xf32>
    %641 = tpu.matmul %639, %640, %cst_219 {dimension_numbers = #tpu.dot_dimension_numbers<[1], [0], [0], [1], [0, 0, 1, 1], [], []>} : vector<8x32xf32>, vector<32x128xf32>, vector<8x128xf32> -> vector<8x128xf32>
    %c0_220 = arith.constant 0 : index
    %c0_221 = arith.constant 0 : index
    %642 = vector.load %arg8[%c0_220, %c0_221] : memref<1x128xf32, #tpu.memory_space<vmem>>, vector<1x128xf32>
    %643 = vector.broadcast %642 : vector<1x128xf32> to vector<8x128xf32>
    %644 = arith.addf %641, %643 : vector<8x128xf32>
    %645 = arith.index_cast %c6_i32_210 : i32 to index
    %c0_222 = arith.constant 0 : index
    %c0_223 = arith.constant 0 : index
    %646 = vector.load %arg9[%645, %c0_222, %c0_223] : memref<7x8x128xf32, #tpu.memory_space<vmem>>, vector<1x8x128xf32>
    %647 = vector.shape_cast %646 : vector<1x8x128xf32> to vector<8x128xf32>
    %648 = vector.shape_cast %644 : vector<8x128xf32> to vector<1x8x128xf32>
    tpu.vector_store %arg9[%645, %c0_222, %c0_223], %648 {strides = array<i32>} : memref<7x8x128xf32, #tpu.memory_space<vmem>>, vector<1x8x128xf32>,
    %649 = tpu.iota {dimensions = array<i32: 1>} : vector<8x128xi32>
    %cst_224 = arith.constant dense<0xFF800000> : vector<8xf32>
    %650 = vector.multi_reduction <maximumf>, %644, %cst_224 [1] : vector<8x128xf32> to vector<8xf32>
    %651 = vector.shape_cast %650 : vector<8xf32> to vector<8x1xf32>
    %652 = vector.broadcast %651 : vector<8x1xf32> to vector<8x128xf32>
    %653 = arith.cmpf oeq, %644, %652 : vector<8x128xf32>
    %c128_i32_225 = arith.constant 128 : i32
    %654 = vector.broadcast %c128_i32_225 : i32 to vector<8x128xi32>
    %655 = arith.select %653, %649, %654 : vector<8x128xi1>, vector<8x128xi32>
    %cst_226 = arith.constant dense<2147483647> : vector<8xi32>
    %656 = vector.multi_reduction <minsi>, %655, %cst_226 [1] : vector<8x128xi32> to vector<8xi32>
    %657 = vector.shape_cast %656 : vector<8xi32> to vector<8x1xi32>
    %658 = vector.broadcast %657 : vector<8x1xi32> to vector<8x128xi32>
    %659 = arith.cmpi eq, %649, %658 : vector<8x128xi32>
    %660 = arith.extui %659 : vector<8x128xi1> to vector<8x128xi32>
    %661 = arith.sitofp %660 : vector<8x128xi32> to vector<8x128xf32>
    %c0_227 = arith.constant 0 : index
    %c0_228 = arith.constant 0 : index
    %662 = vector.load %arg5[%c0_227, %c0_228] : memref<128x128xf32, #tpu.memory_space<vmem>>, vector<128x128xf32>
    %cst_229 = arith.constant dense<0.000000e+00> : vector<8x128xf32>
    %663 = tpu.matmul %661, %662, %cst_229 {dimension_numbers = #tpu.dot_dimension_numbers<[1], [0], [0], [1], [0, 0, 1, 1], [], []>} : vector<8x128xf32>, vector<128x128xf32>, vector<8x128xf32> -> vector<8x128xf32>
    %664 = arith.index_cast %c6_i32_210 : i32 to index
    %665 = memref.load %arg1[%664] : memref<7xi32, #tpu.memory_space<smem>>
    %c0_i32_230 = arith.constant 0 : i32
    %666 = arith.cmpi sgt, %665, %c0_i32_230 : i32
    %c1_i32_231 = arith.constant 1 : i32
    %667 = arith.addi %c6_i32_210, %c1_i32_231 : i32
    %668 = arith.index_cast %667 : i32 to index
    %c0_232 = arith.constant 0 : index
    %c0_233 = arith.constant 0 : index
    %669 = vector.load %arg4[%668, %c0_232, %c0_233] : memref<8x8x128xf32, #tpu.memory_space<vmem>>, vector<1x8x128xf32>
    %670 = vector.shape_cast %669 : vector<1x8x128xf32> to vector<8x128xf32>
    %671 = arith.select %666, %670, %663 : vector<8x128xf32>
    %c7_i32_234 = arith.constant 7 : i32
    return
  }
  func.func @transform_0(%arg0: i32, %arg1: memref<7xi32, #tpu.memory_space<smem>>) -> (i32, i32, i32) {
    %c0_i32 = arith.constant 0 : i32
    %c0_i32_0 = arith.constant 0 : i32
    %c0_i32_1 = arith.constant 0 : i32
    %c0_i32_2 = arith.constant 0 : i32
    return %c0_i32, %c0_i32_0, %c0_i32_1 : i32, i32, i32
  }
  func.func @transform_1(%arg0: i32, %arg1: memref<7xi32, #tpu.memory_space<smem>>) -> (i32, i32) {
    %c0_i32 = arith.constant 0 : i32
    %c0_i32_0 = arith.constant 0 : i32
    %c0_i32_1 = arith.constant 0 : i32
    return %c0_i32, %c0_i32_0 : i32, i32
  }
  func.func @transform_2(%arg0: i32, %arg1: memref<7xi32, #tpu.memory_space<smem>>) -> (i32, i32, i32) {
    %c0_i32 = arith.constant 0 : i32
    %c0_i32_0 = arith.constant 0 : i32
    %c0_i32_1 = arith.constant 0 : i32
    %c0_i32_2 = arith.constant 0 : i32
    return %c0_i32, %c0_i32_0, %c0_i32_1 : i32, i32, i32
  }
  func.func @transform_3(%arg0: i32, %arg1: memref<7xi32, #tpu.memory_space<smem>>) -> (i32, i32) {
    %c0_i32 = arith.constant 0 : i32
    %c0_i32_0 = arith.constant 0 : i32
    %c0_i32_1 = arith.constant 0 : i32
    return %c0_i32, %c0_i32_0 : i32, i32
  }
  func.func @transform_4(%arg0: i32, %arg1: memref<7xi32, #tpu.memory_space<smem>>) -> (i32, i32) {
    %c0_i32 = arith.constant 0 : i32
    %c0_i32_0 = arith.constant 0 : i32
    %c0_i32_1 = arith.constant 0 : i32
    return %c0_i32, %c0_i32_0 : i32, i32
  }
  func.func @transform_5(%arg0: i32, %arg1: memref<7xi32, #tpu.memory_space<smem>>) -> (i32, i32) {
    %c0_i32 = arith.constant 0 : i32
    %c0_i32_0 = arith.constant 0 : i32
    %c0_i32_1 = arith.constant 0 : i32
    return %c0_i32, %c0_i32_0 : i32, i32
  }
  func.func @transform_6(%arg0: i32, %arg1: memref<7xi32, #tpu.memory_space<smem>>) -> (i32, i32) {
    %c0_i32 = arith.constant 0 : i32
    %c0_i32_0 = arith.constant 0 : i32
    %c0_i32_1 = arith.constant 0 : i32
    return %c0_i32, %c0_i32_0 : i32, i32
  }
  func.func @transform_7(%arg0: i32, %arg1: memref<7xi32, #tpu.memory_space<smem>>) -> (i32, i32, i32) {
    %c0_i32 = arith.constant 0 : i32
    %c0_i32_0 = arith.constant 0 : i32
    %c0_i32_1 = arith.constant 0 : i32
    %c0_i32_2 = arith.constant 0 : i32
    return %c0_i32, %c0_i32_0, %c0_i32_1 : i32, i32, i32
  }
}

</mosaic_0001>

<bundles_post_ra>
// kernel: seq2seq_forward.1
= control target key start
LH: loop header
LB: loop body
LE: loop exit
PB: predicated region body
PF: predicated region fallthrough
CT: control target
= control target key end

     0   :  { %s4699_s0 = inlined_call_operand.vmem [shape: s32[7], index: 0, kind: input, shape index: {}]   ;;  %s4700_s1 = inlined_call_operand.vmem [shape: f32[8,8,128], index: 1, kind: input, shape index: {}]   ;;  %s4701_s2 = inlined_call_operand.vmem [shape: f32[32,128], index: 2, kind: input, shape index: {}]   ;;  %s4702_s3 = inlined_call_operand.vmem [shape: f32[8,8,128], index: 3, kind: input, shape index: {}]   ;;  %s4703_s4 = inlined_call_operand.vmem [shape: f32[128,128], index: 4, kind: input, shape index: {}]   ;;  %s4704_s5 = inlined_call_operand.vmem [shape: f32[32,128], index: 5, kind: input, shape index: {}]   ;;  %s4705_s6 = inlined_call_operand.vmem [shape: f32[32,128], index: 6, kind: input, shape index: {}]   ;;  %s4706_s7 = inlined_call_operand.vmem [shape: f32[1,128], index: 7, kind: input, shape index: {}]   ;;  %s4707_s8 = inlined_call_operand.vmem [shape: f32[7,8,128], index: 8, kind: output, shape index: {}]  }
   0x1   :  { %s13_s29 = sshll.u32 %s4699_s0, 4  ;;  %s14_s29 = int_to_ptr.vmem [resolvable:$true] %s13_s29 }
   0x2   :  { %s4007_s30 = scalar_lea.vmem %s14_s29, 16  ;;  %p4012_p1 = scmp.lt.s32.totalorder %s14_s29, %s14_s29 }
   0x3   :  { %p4008_p0 = scmp.ne.s32.totalorder %s14_s29, %s4007_s30  ;;  %p4013_p2 = scmp.lt.s32.totalorder %s4007_s30, %s4007_s30 }
   0x5   :  { %p4014_p3 = por %p4013_p2, %p4012_p1 }
   0x7   :  { %p4015_p4 = pnand %p4014_p3, %p4008_p0 }
   0x9   :  { %4018 = shalt.err (!%p4015_p4)  }
   0xa   :  { %s4021_s9 = smov [#allocation3]  }
   0xb   :  { %16 = dma.vmem_to_smem %s14_s29, 16, %s4021_s9, [#allocation2] }
   0xc   :  { %4019 = dma.done.wait [#allocation2], 16 }
   0xd   :  { %4020 = vsyncadd [#allocation2], 4294967280 }
   0xe   :  { %18 = sfence }
   0xf   :  { %v34_v0 = vld [vmem:[%s4701_s2] sm:$0xff]  ;;  %v35_v1 = vld [vmem:[%s4701_s2 + $0x8] sm:$0xff]  ;;  %v36_v2 = vld [vmem:[%s4701_s2 + $0x10] sm:$0xff]  ;;  %v4022_v3 = vmov 0.0|0.0   ;;  %vm4023_vm0 = vmmov 0   ;;  %v4024_v6 = vmov 0.0  }
  0x10   :  { %3604 = vmatprep.subr.bf16.mxu0 %v4022_v3  ;;  %v4086_v4 = vpack.c.bf16 %v35_v1, %v34_v0  ;;  %v37_v5 = vld [vmem:[%s4701_s2 + $0x18] sm:$0xff]  ;;  %3160 = vmatprep.mubr.msk.f32.mxu0 %vm4023_vm0, %v4024_v6  ;;  %v33_v8 = vld [vmem:[%s4700_s1] sm:$0xff]  ;;  %s4025_s18 = smov 64   ;;  %s4026_s19 = smov 32   ;;  %vm38_vm1 = vcmask 261120   ;;  %v2862_v26 = vld [vmem:[%s4700_s1 + $0x8] sm:$0xff] }
  0x11   :  { %3610 = vmatprep.subr.bf16.mxu1 %v4022_v3  ;;  %3171 = vmatprep.mubr.msk.f32.mxu1 %vm4023_vm0, %v4024_v6  ;;  %v4097_v7 = vpack.c.bf16 %v37_v5, %v36_v2  ;;  %v2865_v44 = vld [vmem:[%s4700_s1 + $0x10] sm:$0xff]  ;;  %v2868_v62 = vld [vmem:[%s4700_s1 + $0x18] sm:$0xff]  ;;  %s1152_s17 = sld [smem:[#allocation3]]  ;;  %s2897_s25 = sld [smem:[#allocation3 + $0x1]] }
  0x12   :  { %3606 = vmatpush3.bf16.msra.mxu0 %v4086_v4  ;;  %3612 = vmatpush3.bf16.msra.mxu1 %v4086_v4  ;;  %s2906_s9 = sld [smem:[#allocation3 + $0x2]]  ;;  %s2915_s0 = sld [smem:[#allocation3 + $0x3]] }
  0x13   :  { %3607 = vmatprep.subr.bf16.mxu0 %v4022_v3  ;;  %3613 = vmatprep.subr.bf16.mxu1 %v4022_v3  ;;  %s2924_s27 = sld [smem:[#allocation3 + $0x4]]  ;;  %s2933_s24 = sld [smem:[#allocation3 + $0x5]] }
  0x16   :  { %3609 = vmatpush3.bf16.msra.mxu0 %v4097_v7  ;;  %3615 = vmatpush3.bf16.msra.mxu1 %v4097_v7 }
  0x17   :  { %3616 = vmatprep.subr.bf16.mxu0 %v4022_v3  ;;  %3622 = vmatprep.subr.bf16.mxu1 %v4022_v3  ;;  %p1153_p5 = scmp.gt.s32.totalorder %s1152_s17, 0  ;;  %p1455_p6 = scmp.gt.s32.totalorder %s2897_s25, 0 }
  0x18   :  { %p1757_p7 = scmp.gt.s32.totalorder %s2906_s9, 0  ;;  %p2059_p8 = scmp.gt.s32.totalorder %s2915_s0, 0 }
  0x19   :  { %3161 = vmatmul.mubr.f32.vlgmr.msra.gmra.mrb[0].mxu0 %v4024_v6  ;;  %s1156_s20 = scalar_select %p1153_p5, 1, 0 }
  0x1a   :  { %3618 = vmatpush3.bf16.msra.mxu0 %v4086_v4  ;;  %3182 = vmatprep.mubr.msk.f32.mxu0 %vm4023_vm0, %v4024_v6  ;;  %s1458_s26 = scalar_select %p1455_p6, 1, 0 }
  0x1b   :  { %3619 = vmatprep.subr.bf16.mxu0 %v4022_v3  ;;  %s1760_s10 = scalar_select %p1757_p7, 1, 0 }
  0x1c   :  { %s2062_s14 = scalar_select %p2059_p8, 1, 0 }
  0x1d   :  { %p2361_p9 = scmp.gt.s32.totalorder %s2924_s27, 0  ;;  %p2663_p10 = scmp.gt.s32.totalorder %s2933_s24, 0 }
  0x1e   :  { %3621 = vmatpush3.bf16.msra.mxu0 %v4097_v7 }
  0x1f   :  { %3628 = vmatprep.subr.bf16.mxu0 %v4022_v3  ;;  %s2364_s28 = scalar_select %p2361_p9, 1, 0 }
  0x20   :  { %s2666_s25 = scalar_select %p2663_p10, 1, 0 }
  0xec   :  { %v108_v9 = vpop.f32.mrb[0].mxu0 }
  0xed   :  { %v112_v10 = vadd.f32 %v108_v9, %v33_v8  ;;  %v3162_v11 = vpop.f32.mrb[1].mxu0 }
  0xef   :  { %3887 = vtanh.f32 %v112_v10  ;;  %v2861_v13 = vmul.f32 -1.442695, %v112_v10 }
  0xf1   :  { %3889 = vpow2.f32 %v2861_v13 }
  0xf9   :  { %v3888_v12 = vpop.eup %3887 }
  0xfa   :  { %122 = vrot.lane.b32.xlu0 %v3888_v12, %s4025_s18 }
  0xfb   :  { %v3890_v14 = vpop.eup %3889 }
  0xfc   :  { %v116_v15 = vadd.f32 1.0, %v3890_v14 }
  0xfe   :  { %3891 = vrcp.f32 %v116_v15 }
 0x108   :  { %v3892_v16 = vpop.eup %3891 }
 0x109   :  { %v120_v19 = vmul.f32 0.0, %v3892_v16 }
 0x16c   :  { %v123_v17 = vpop.permute.xlu0 %122 }
 0x16d   :  { %v125_v18 = vmul.f32 %v3892_v16, %v123_v17 }
 0x16f   :  { %127 = vrot.lane.b32.xlu0 %v125_v18, %s4026_s19 }
 0x1e1   :  { %v128_v20 = vpop.permute.xlu0 %127 }
 0x1e2   :  { %v130_v21 = vadd.f32 %v128_v20, %v120_v19  ;;  %v2871_v20 = vld [vmem:[%s4700_s1 + $0x20] sm:$0xff] }
 0x1e4   :  { %3893 = vtanh.f32 %v130_v21 }
 0x1ee   :  { %v3894_v22 = vpop.eup %3893 }
 0x1ef   :  { %133 = vrot.lane.b32.xlu1 %v3894_v22, %s4025_s18 }
 0x261   :  { %v134_v23 = vpop.permute.xlu1 %133 }
 0x262   :  { %v136_v24 = vmul.f32 %v3892_v16, %v134_v23 }
 0x264   :  { %140 = vrot.lane.b32.xlu1 %v136_v24, %s4026_s19 }
 0x2d6   :  { %v141_v25 = vpop.permute.xlu1 %140 }
 0x2d7   :  { %3172 = vmatmul.mubr.msk.f32.vlgmr.msra.gmra.mrb[0].mxu1 %vm38_vm1, %v141_v25 }
 0x2d8   :  { %3624 = vmatpush3.bf16.msra.mxu1 %v4086_v4  ;;  %3193 = vmatprep.mubr.msk.f32.mxu1 %vm4023_vm0, %v4024_v6 }
 0x2d9   :  { %3625 = vmatprep.subr.bf16.mxu1 %v4022_v3 }
 0x2dc   :  { %3627 = vmatpush3.bf16.msra.mxu1 %v4097_v7 }
 0x2dd   :  { %3634 = vmatprep.subr.bf16.mxu1 %v4022_v3 }
 0x3aa   :  { %v210_v27 = vpop.f32.mrb[0].mxu1 }
 0x3ab   :  { %v214_v28 = vadd.f32 %v2862_v26, %v210_v27  ;;  %v3173_v29 = vpop.f32.mrb[1].mxu1 }
 0x3ad   :  { %3895 = vtanh.f32 %v214_v28  ;;  %v2864_v31 = vmul.f32 -1.442695, %v214_v28 }
 0x3af   :  { %3897 = vpow2.f32 %v2864_v31 }
 0x3b7   :  { %v3896_v30 = vpop.eup %3895 }
 0x3b8   :  { %224 = vrot.lane.b32.xlu0 %v3896_v30, %s4025_s18 }
 0x3b9   :  { %v3898_v32 = vpop.eup %3897 }
 0x3ba   :  { %v218_v33 = vadd.f32 1.0, %v3898_v32 }
 0x3bc   :  { %3899 = vrcp.f32 %v218_v33 }
 0x3c6   :  { %v3900_v34 = vpop.eup %3899 }
 0x3c7   :  { %v222_v37 = vmul.f32 %v3900_v34, %v130_v21 }
 0x42a   :  { %v225_v35 = vpop.permute.xlu0 %224 }
 0x42b   :  { %v227_v36 = vmul.f32 %v3900_v34, %v225_v35 }
 0x42d   :  { %229 = vrot.lane.b32.xlu1 %v227_v36, %s4026_s19 }
 0x49f   :  { %v230_v38 = vpop.permute.xlu1 %229 }
 0x4a0   :  { %v232_v39 = vadd.f32 %v230_v38, %v222_v37  ;;  %v2874_v38 = vld [vmem:[%s4700_s1 + $0x28] sm:$0xff] }
 0x4a2   :  { %3901 = vtanh.f32 %v232_v39 }
 0x4ac   :  { %v3902_v40 = vpop.eup %3901 }
 0x4ad   :  { %235 = vrot.lane.b32.xlu0 %v3902_v40, %s4025_s18 }
 0x51f   :  { %v236_v41 = vpop.permute.xlu0 %235 }
 0x520   :  { %v238_v42 = vmul.f32 %v3900_v34, %v236_v41 }
 0x522   :  { %242 = vrot.lane.b32.xlu1 %v238_v42, %s4026_s19 }
 0x594   :  { %v243_v43 = vpop.permute.xlu1 %242 }
 0x595   :  { %3183 = vmatmul.mubr.msk.f32.vlgmr.msra.gmra.mrb[2].mxu0 %vm38_vm1, %v243_v43 }
 0x596   :  { %3630 = vmatpush3.bf16.msra.mxu0 %v4086_v4  ;;  %3204 = vmatprep.mubr.msk.f32.mxu0 %vm4023_vm0, %v4024_v6 }
 0x597   :  { %3631 = vmatprep.subr.bf16.mxu0 %v4022_v3 }
 0x59a   :  { %3633 = vmatpush3.bf16.msra.mxu0 %v4097_v7 }
 0x59b   :  { %3640 = vmatprep.subr.bf16.mxu0 %v4022_v3 }
 0x668   :  { %v312_v45 = vpop.f32.mrb[2].mxu0 }
 0x669   :  { %v316_v46 = vadd.f32 %v2865_v44, %v312_v45  ;;  %v3184_v47 = vpop.f32.mrb[3].mxu0 }
 0x66b   :  { %3903 = vtanh.f32 %v316_v46  ;;  %v2867_v49 = vmul.f32 -1.442695, %v316_v46 }
 0x66d   :  { %3905 = vpow2.f32 %v2867_v49 }
 0x675   :  { %v3904_v48 = vpop.eup %3903 }
 0x676   :  { %326 = vrot.lane.b32.xlu0 %v3904_v48, %s4025_s18 }
 0x677   :  { %v3906_v50 = vpop.eup %3905 }
 0x678   :  { %v320_v51 = vadd.f32 1.0, %v3906_v50 }
 0x67a   :  { %3907 = vrcp.f32 %v320_v51 }
 0x684   :  { %v3908_v52 = vpop.eup %3907 }
 0x685   :  { %v324_v55 = vmul.f32 %v3908_v52, %v232_v39 }
 0x6e8   :  { %v327_v53 = vpop.permute.xlu0 %326 }
 0x6e9   :  { %v329_v54 = vmul.f32 %v3908_v52, %v327_v53 }
 0x6eb   :  { %331 = vrot.lane.b32.xlu1 %v329_v54, %s4026_s19  ;;  %v2877_v54 = vld [vmem:[%s4700_s1 + $0x30] sm:$0xff] }
 0x75d   :  { %v332_v56 = vpop.permute.xlu1 %331 }
 0x75e   :  { %v334_v57 = vadd.f32 %v332_v56, %v324_v55 }
 0x760   :  { %3909 = vtanh.f32 %v334_v57 }
 0x76a   :  { %v3910_v58 = vpop.eup %3909 }
 0x76b   :  { %337 = vrot.lane.b32.xlu0 %v3910_v58, %s4025_s18 }
 0x7dd   :  { %v338_v59 = vpop.permute.xlu0 %337 }
 0x7de   :  { %v340_v60 = vmul.f32 %v3908_v52, %v338_v59 }
 0x7e0   :  { %344 = vrot.lane.b32.xlu1 %v340_v60, %s4026_s19 }
 0x852   :  { %v345_v61 = vpop.permute.xlu1 %344 }
 0x853   :  { %3194 = vmatmul.mubr.msk.f32.vlgmr.msra.gmra.mrb[2].mxu1 %vm38_vm1, %v345_v61 }
 0x854   :  { %3636 = vmatpush3.bf16.msra.mxu1 %v4086_v4  ;;  %3215 = vmatprep.mubr.msk.f32.mxu1 %vm4023_vm0, %v4024_v6 }
 0x855   :  { %3637 = vmatprep.subr.bf16.mxu1 %v4022_v3 }
 0x858   :  { %3639 = vmatpush3.bf16.msra.mxu1 %v4097_v7 }
 0x859   :  { %3646 = vmatprep.subr.bf16.mxu1 %v4022_v3 }
 0x926   :  { %v414_v63 = vpop.f32.mrb[2].mxu1 }
 0x927   :  { %v418_v0 = vadd.f32 %v2868_v62, %v414_v63  ;;  %v3195_v1 = vpop.f32.mrb[3].mxu1 }
 0x929   :  { %3911 = vtanh.f32 %v418_v0  ;;  %v2870_v5 = vmul.f32 -1.442695, %v418_v0 }
 0x92b   :  { %3913 = vpow2.f32 %v2870_v5 }
 0x933   :  { %v3912_v2 = vpop.eup %3911 }
 0x934   :  { %428 = vrot.lane.b32.xlu0 %v3912_v2, %s4025_s18 }
 0x935   :  { %v3914_v8 = vpop.eup %3913 }
 0x936   :  { %v422_v9 = vadd.f32 1.0, %v3914_v8 }
 0x938   :  { %3915 = vrcp.f32 %v422_v9 }
 0x942   :  { %v3916_v10 = vpop.eup %3915 }
 0x943   :  { %v426_v13 = vmul.f32 %v3916_v10, %v334_v57 }
 0x9a6   :  { %v429_v11 = vpop.permute.xlu0 %428 }
 0x9a7   :  { %v431_v12 = vmul.f32 %v3916_v10, %v429_v11 }
 0x9a9   :  { %433 = vrot.lane.b32.xlu1 %v431_v12, %s4026_s19  ;;  %v2880_v12 = vld [vmem:[%s4700_s1 + $0x38] sm:$0xff] }
 0xa1b   :  { %v434_v14 = vpop.permute.xlu1 %433 }
 0xa1c   :  { %v436_v15 = vadd.f32 %v434_v14, %v426_v13 }
 0xa1e   :  { %3917 = vtanh.f32 %v436_v15 }
 0xa28   :  { %v3918_v16 = vpop.eup %3917 }
 0xa29   :  { %439 = vrot.lane.b32.xlu0 %v3918_v16, %s4025_s18 }
 0xa9b   :  { %v440_v17 = vpop.permute.xlu0 %439 }
 0xa9c   :  { %v442_v18 = vmul.f32 %v3916_v10, %v440_v17 }
 0xa9e   :  { %446 = vrot.lane.b32.xlu1 %v442_v18, %s4026_s19 }
 0xb10   :  { %v447_v19 = vpop.permute.xlu1 %446 }
 0xb11   :  { %3205 = vmatmul.mubr.msk.f32.vlgmr.msra.gmra.mrb[4].mxu0 %vm38_vm1, %v447_v19 }
 0xb12   :  { %3642 = vmatpush3.bf16.msra.mxu0 %v4086_v4  ;;  %3226 = vmatprep.mubr.msk.f32.mxu0 %vm4023_vm0, %v4024_v6 }
 0xb13   :  { %3643 = vmatprep.subr.bf16.mxu0 %v4022_v3 }
 0xb16   :  { %3645 = vmatpush3.bf16.msra.mxu0 %v4097_v7 }
 0xb17   :  { %3652 = vmatprep.subr.bf16.mxu0 %v4022_v3 }
 0xbe4   :  { %v516_v21 = vpop.f32.mrb[4].mxu0 }
 0xbe5   :  { %v520_v22 = vadd.f32 %v2871_v20, %v516_v21  ;;  %v3206_v23 = vpop.f32.mrb[5].mxu0 }
 0xbe7   :  { %3919 = vtanh.f32 %v520_v22  ;;  %v2873_v25 = vmul.f32 -1.442695, %v520_v22 }
 0xbe9   :  { %3921 = vpow2.f32 %v2873_v25 }
 0xbf1   :  { %v3920_v24 = vpop.eup %3919 }
 0xbf2   :  { %530 = vrot.lane.b32.xlu0 %v3920_v24, %s4025_s18 }
 0xbf3   :  { %v3922_v26 = vpop.eup %3921 }
 0xbf4   :  { %v524_v27 = vadd.f32 1.0, %v3922_v26  ;;  %v852_v26 = vld [vmem:[%s4704_s5] sm:$0xff] }
 0xbf6   :  { %3923 = vrcp.f32 %v524_v27  ;;  %v853_v27 = vld [vmem:[%s4704_s5 + $0x8] sm:$0xff] }
 0xc00   :  { %v3924_v28 = vpop.eup %3923 }
 0xc01   :  { %v528_v31 = vmul.f32 %v3924_v28, %v436_v15 }
 0xc64   :  { %v531_v29 = vpop.permute.xlu0 %530 }
 0xc65   :  { %v533_v30 = vmul.f32 %v3924_v28, %v531_v29  ;;  %v4217_v29 = vpack.c.bf16 %v853_v27, %v852_v26  ;;  %v1077_v26 = vld [vmem:[%s4703_s4 + $0x58] sm:$0xff] }
 0xc67   :  { %535 = vrot.lane.b32.xlu1 %v533_v30, %s4026_s19  ;;  %v855_v30 = vld [vmem:[%s4704_s5 + $0x18] sm:$0xff] }
 0xcd9   :  { %v536_v32 = vpop.permute.xlu1 %535 }
 0xcda   :  { %v538_v33 = vadd.f32 %v536_v32, %v528_v31 }
 0xcdc   :  { %3925 = vtanh.f32 %v538_v33 }
 0xce6   :  { %v3926_v34 = vpop.eup %3925 }
 0xce7   :  { %541 = vrot.lane.b32.xlu0 %v3926_v34, %s4025_s18 }
 0xd59   :  { %v542_v35 = vpop.permute.xlu0 %541 }
 0xd5a   :  { %v544_v36 = vmul.f32 %v3924_v28, %v542_v35  ;;  %v854_v28 = vld [vmem:[%s4704_s5 + $0x10] sm:$0xff] }
 0xd5b   :  { %v4223_v31 = vpack.c.bf16 %v855_v30, %v854_v28  ;;  %v1078_v28 = vld [vmem:[%s4703_s4 + $0x60] sm:$0xff]  ;;  %v1079_v30 = vld [vmem:[%s4703_s4 + $0x68] sm:$0xff] }
 0xd5c   :  { %548 = vrot.lane.b32.xlu1 %v544_v36, %s4026_s19  ;;  %v851_v36 = vld [vmem:[%s4702_s3] sm:$0xff] }
 0xdce   :  { %v549_v37 = vpop.permute.xlu1 %548 }
 0xdcf   :  { %3216 = vmatmul.mubr.msk.f32.vlgmr.msra.gmra.mrb[4].mxu1 %vm38_vm1, %v549_v37 }
 0xdd0   :  { %3648 = vmatpush3.bf16.msra.mxu1 %v4086_v4  ;;  %3237 = vmatprep.mubr.msk.f32.mxu1 %vm4023_vm0, %v4024_v6 }
 0xdd1   :  { %3649 = vmatprep.subr.bf16.mxu1 %v4022_v3 }
 0xdd4   :  { %3651 = vmatpush3.bf16.msra.mxu1 %v4097_v7 }
 0xdd5   :  { %3658 = vmatprep.subr.bf16.mxu1 %v4022_v3 }
 0xea2   :  { %v618_v39 = vpop.f32.mrb[4].mxu1 }
 0xea3   :  { %v622_v40 = vadd.f32 %v2874_v38, %v618_v39  ;;  %v3217_v41 = vpop.f32.mrb[5].mxu1 }
 0xea5   :  { %3927 = vtanh.f32 %v622_v40  ;;  %v2876_v4 = vmul.f32 -1.442695, %v622_v40 }
 0xea7   :  { %3929 = vpow2.f32 %v2876_v4 }
 0xeaf   :  { %v3928_v42 = vpop.eup %3927 }
 0xeb0   :  { %632 = vrot.lane.b32.xlu0 %v3928_v42, %s4025_s18 }
 0xeb1   :  { %v3930_v43 = vpop.eup %3929 }
 0xeb2   :  { %v626_v44 = vadd.f32 1.0, %v3930_v43 }
 0xeb4   :  { %3931 = vrcp.f32 %v626_v44 }
 0xebe   :  { %v3932_v45 = vpop.eup %3931 }
 0xebf   :  { %v630_v47 = vmul.f32 %v3932_v45, %v538_v33 }
 0xf22   :  { %v633_v7 = vpop.permute.xlu0 %632 }
 0xf23   :  { %v635_v46 = vmul.f32 %v3932_v45, %v633_v7 }
 0xf25   :  { %637 = vrot.lane.b32.xlu1 %v635_v46, %s4026_s19 }
 0xf97   :  { %v638_v48 = vpop.permute.xlu1 %637 }
 0xf98   :  { %v640_v49 = vadd.f32 %v638_v48, %v630_v47  ;;  %v956_v48 = vld [vmem:[%s4705_s6] sm:$0xff] }
 0xf9a   :  { %3933 = vtanh.f32 %v640_v49 }
 0xfa4   :  { %v3934_v50 = vpop.eup %3933 }
 0xfa5   :  { %643 = vrot.lane.b32.xlu0 %v3934_v50, %s4025_s18  ;;  %v958_v50 = vld [vmem:[%s4705_s6 + $0x10] sm:$0xff] }
0x1017   :  { %v644_v51 = vpop.permute.xlu0 %643 }
0x1018   :  { %v646_v52 = vmul.f32 %v3932_v45, %v644_v51 }
0x101a   :  { %650 = vrot.lane.b32.xlu1 %v646_v52, %s4026_s19  ;;  %v959_v52 = vld [vmem:[%s4705_s6 + $0x18] sm:$0xff] }
0x108c   :  { %v651_v53 = vpop.permute.xlu1 %650 }
0x108d   :  { %3227 = vmatmul.mubr.msk.f32.vlgmr.msra.gmra.mrb[6].mxu0 %vm38_vm1, %v651_v53  ;;  %v4256_v53 = vpack.c.bf16 %v959_v52, %v958_v50 }
0x108e   :  { %3248 = vmatprep.mubr.msk.f32.mxu0 %vm4023_vm0, %v4024_v6  ;;  %3654 = vmatpush3.bf16.msra.mxu0 %v4217_v29 }
0x108f   :  { %3655 = vmatprep.subr.bf16.mxu0 %v4022_v3 }
0x1092   :  { %3657 = vmatpush3.bf16.msra.mxu0 %v4223_v31 }
0x1093   :  { %3664 = vmatprep.subr.bf16.mxu0 %v4022_v3 }
0x1160   :  { %v720_v55 = vpop.f32.mrb[6].mxu0 }
0x1161   :  { %v724_v56 = vadd.f32 %v2877_v54, %v720_v55  ;;  %v3228_v57 = vpop.f32.mrb[7].mxu0 }
0x1163   :  { %3935 = vtanh.f32 %v724_v56  ;;  %v2879_v59 = vmul.f32 -1.442695, %v724_v56 }
0x1165   :  { %3937 = vpow2.f32 %v2879_v59 }
0x116d   :  { %v3936_v58 = vpop.eup %3935 }
0x116e   :  { %734 = vrot.lane.b32.xlu0 %v3936_v58, %s4025_s18  ;;  %v4280_v58 = vld [vmem:[%s4706_s7] ss:$0 sm:$0xff] }
0x116f   :  { %v3938_v60 = vpop.eup %3937 }
0x1170   :  { %v728_v61 = vadd.f32 1.0, %v3938_v60 }
0x1172   :  { %3939 = vrcp.f32 %v728_v61 }
0x117c   :  { %v3940_v62 = vpop.eup %3939 }
0x117d   :  { %v732_v1 = vmul.f32 %v3940_v62, %v640_v49  ;;  %v957_v49 = vld [vmem:[%s4705_s6 + $0x8] sm:$0xff] }
0x117e   :  { %v4250_v51 = vpack.c.bf16 %v957_v49, %v956_v48 }
0x11e0   :  { %v735_v63 = vpop.permute.xlu0 %734 }
0x11e1   :  { %v737_v0 = vmul.f32 %v3940_v62, %v735_v63 }
0x11e3   :  { %739 = vrot.lane.b32.xlu1 %v737_v0, %s4026_s19  ;;  %v1043_v0 = vlaneseq }
0x1255   :  { %v740_v2 = vpop.permute.xlu1 %739 }
0x1256   :  { %v742_v5 = vadd.f32 %v740_v2, %v732_v1  ;;  %v4288_v1 = vand.u32 127, %v1043_v0 }
0x1258   :  { %3941 = vtanh.f32 %v742_v5 }
0x1262   :  { %v3942_v8 = vpop.eup %3941 }
0x1263   :  { %745 = vrot.lane.b32.xlu0 %v3942_v8, %s4025_s18 }
0x12d5   :  { %v746_v9 = vpop.permute.xlu0 %745 }
0x12d6   :  { %v748_v10 = vmul.f32 %v3940_v62, %v746_v9 }
0x12d8   :  { %752 = vrot.lane.b32.xlu1 %v748_v10, %s4026_s19  ;;  %v1066_v10 = vld [vmem:[%s4703_s4] sm:$0xff] }
0x134a   :  { %v753_v11 = vpop.permute.xlu1 %752 }
0x134b   :  { %3238 = vmatmul.mubr.msk.f32.vlgmr.msra.gmra.mrb[6].mxu1 %vm38_vm1, %v753_v11  ;;  %v1067_v11 = vld [vmem:[%s4703_s4 + $0x8] sm:$0xff] }
0x134c   :  { %3259 = vmatprep.mubr.msk.f32.mxu1 %vm4023_vm0, %v4024_v6  ;;  %3660 = vmatpush3.bf16.msra.mxu1 %v4250_v51 }
0x134d   :  { %3661 = vmatprep.subr.bf16.mxu1 %v4022_v3 }
0x1350   :  { %3663 = vmatpush3.bf16.msra.mxu1 %v4256_v53 }
0x1351   :  { %3688 = vmatprep.subr.bf16.mxu1 %v4022_v3 }
0x141e   :  { %v822_v13 = vpop.f32.mrb[6].mxu1 }
0x141f   :  { %v826_v14 = vadd.f32 %v2880_v12, %v822_v13  ;;  %v3239_v15 = vpop.f32.mrb[7].mxu1  ;;  %v1068_v12 = vld [vmem:[%s4703_s4 + $0x10] sm:$0xff]  ;;  %v4300_v13 = vpack.c.bf16 %v1067_v11, %v1066_v10 }
0x1421   :  { %3943 = vtanh.f32 %v826_v14  ;;  %v2882_v17 = vmul.f32 -1.442695, %v826_v14  ;;  %v1069_v14 = vld [vmem:[%s4703_s4 + $0x18] sm:$0xff] }
0x1422   :  { %v4306_v15 = vpack.c.bf16 %v1069_v14, %v1068_v12 }
0x1423   :  { %3945 = vpow2.f32 %v2882_v17  ;;  %v1071_v17 = vld [vmem:[%s4703_s4 + $0x28] sm:$0xff] }
0x142b   :  { %v3944_v16 = vpop.eup %3943 }
0x142c   :  { %836 = vrot.lane.b32.xlu0 %v3944_v16, %s4025_s18  ;;  %v1070_v16 = vld [vmem:[%s4703_s4 + $0x20] sm:$0xff] }
0x142d   :  { %v3946_v18 = vpop.eup %3945 }
0x142e   :  { %v830_v19 = vadd.f32 1.0, %v3946_v18  ;;  %v4316_v18 = vpack.c.bf16 %v1071_v17, %v1070_v16 }
0x1430   :  { %3947 = vrcp.f32 %v830_v19  ;;  %v1072_v19 = vld [vmem:[%s4703_s4 + $0x30] sm:$0xff] }
0x143a   :  { %v3948_v20 = vpop.eup %3947 }
0x143b   :  { %v834_v23 = vmul.f32 %v3948_v20, %v742_v5 }
0x149e   :  { %v837_v21 = vpop.permute.xlu0 %836 }
0x149f   :  { %v839_v22 = vmul.f32 %v3948_v20, %v837_v21 }
0x14a1   :  { %841 = vrot.lane.b32.xlu1 %v839_v22, %s4026_s19  ;;  %v1074_v22 = vld [vmem:[%s4703_s4 + $0x40] sm:$0xff] }
0x1513   :  { %v842_v24 = vpop.permute.xlu1 %841 }
0x1514   :  { %v844_v25 = vadd.f32 %v842_v24, %v834_v23  ;;  %v1075_v23 = vld [vmem:[%s4703_s4 + $0x48] sm:$0xff] }
0x1515   :  { %v4336_v24 = vpack.c.bf16 %v1075_v23, %v1074_v22 }
0x1516   :  { %3949 = vtanh.f32 %v844_v25 }
0x1520   :  { %v3950_v32 = vpop.eup %3949 }
0x1521   :  { %847 = vrot.lane.b32.xlu0 %v3950_v32, %s4025_s18  ;;  %v4356_v32 = vpack.c.bf16 %v1079_v30, %v1078_v28 }
0x1593   :  { %v848_v33 = vpop.permute.xlu0 %847 }
0x1594   :  { %v850_v34 = vmul.f32 %v3948_v20, %v848_v33  ;;  %v1073_v20 = vld [vmem:[%s4703_s4 + $0x38] sm:$0xff] }
0x1595   :  { %v4326_v21 = vpack.c.bf16 %v1073_v20, %v1072_v19 }
0x1596   :  { %857 = vrot.lane.b32.xlu1 %v850_v34, %s4026_s19 }
0x1608   :  { %v858_v35 = vpop.permute.xlu1 %857 }
0x1609   :  { %3249 = vmatmul.mubr.msk.f32.vlgmr.msra.gmra.mrb[8].mxu0 %vm38_vm1, %v858_v35 }
0x160a   :  { %3294 = vmatprep.mubr.msk.f32.mxu0 %vm4023_vm0, %v4024_v6  ;;  %3666 = vmatpush3.bf16.msra.mxu0 %v4300_v13 }
0x160b   :  { %3667 = vmatprep.subr.bf16.mxu0 %v4022_v3 }
0x160e   :  { %3669 = vmatpush3.bf16.msra.mxu0 %v4306_v15 }
0x160f   :  { %3670 = vmatprep.subr.bf16.mxu0 %v4022_v3 }
0x1612   :  { %3672 = vmatpush3.bf16.msra.mxu0 %v4316_v18 }
0x1613   :  { %3673 = vmatprep.subr.bf16.mxu0 %v4022_v3 }
0x1616   :  { %3675 = vmatpush3.bf16.msra.mxu0 %v4326_v21 }
0x1617   :  { %3676 = vmatprep.subr.bf16.mxu0 %v4022_v3 }
0x161a   :  { %3678 = vmatpush3.bf16.msra.mxu0 %v4336_v24 }
0x161b   :  { %3679 = vmatprep.subr.bf16.mxu0 %v4022_v3 }
0x16dc   :  { %v927_v37 = vpop.f32.mrb[8].mxu0 }
0x16dd   :  { %v931_v38 = vadd.f32 %v927_v37, %v851_v36  ;;  %v3250_v39 = vpop.f32.mrb[9].mxu0  ;;  %v1080_v37 = vld [vmem:[%s4703_s4 + $0x70] sm:$0xff] }
0x16df   :  { %3951 = vtanh.f32 %v931_v38  ;;  %v2884_v41 = vmul.f32 -1.442695, %v931_v38  ;;  %v1081_v38 = vld [vmem:[%s4703_s4 + $0x78] sm:$0xff] }
0x16e0   :  { %v4367_v39 = vpack.c.bf16 %v1081_v38, %v1080_v37 }
0x16e1   :  { %3953 = vpow2.f32 %v2884_v41 }
0x16e9   :  { %v3952_v40 = vpop.eup %3951 }
0x16ea   :  { %941 = vrot.lane.b32.xlu0 %v3952_v40, %s4025_s18 }
0x16eb   :  { %v3954_v42 = vpop.eup %3953 }
0x16ec   :  { %v935_v4 = vadd.f32 1.0, %v3954_v42 }
0x16ee   :  { %3955 = vrcp.f32 %v935_v4 }
0x16f8   :  { %v3956_v43 = vpop.eup %3955 }
0x16f9   :  { %v939_v7 = vmul.f32 %v3956_v43, %v844_v25  ;;  %v1076_v25 = vld [vmem:[%s4703_s4 + $0x50] sm:$0xff] }
0x16fa   :  { %v4346_v27 = vpack.c.bf16 %v1077_v26, %v1076_v25 }
0x16fc   :  { %3681 = vmatpush3.bf16.msra.mxu0 %v4346_v27 }
0x16fd   :  { %3682 = vmatprep.subr.bf16.mxu0 %v4022_v3 }
0x1700   :  { %3684 = vmatpush3.bf16.msra.mxu0 %v4356_v32 }
0x1701   :  { %3685 = vmatprep.subr.bf16.mxu0 %v4022_v3 }
0x1704   :  { %3687 = vmatpush3.bf16.msra.mxu0 %v4367_v39 }
0x1705   :  { %3724 = vmatprep.subr.bf16.mxu0 %v4022_v3 }
0x175c   :  { %v942_v44 = vpop.permute.xlu0 %941 }
0x175d   :  { %v944_v45 = vmul.f32 %v3956_v43, %v942_v44  ;;  %v4027_v44 = vmov 1.0  }
0x175f   :  { %946 = vrot.lane.b32.xlu1 %v944_v45, %s4026_s19  ;;  %v1157_v45 = vstv %s1156_s20 }
0x1760   :  { %vm1158_vm5 = vcmp.eq.s32.totalorder %v1157_v45, 1 }
0x17d1   :  { %v947_v46 = vpop.permute.xlu1 %946 }
0x17d2   :  { %v4238_v47 = vadd.f32 %v947_v46, %v939_v7  ;;  %v2889_v7 = vld [vmem:[%s4702_s3 + $0x8] sm:$0xff] }
0x17d4   :  { %3957 = vtanh.f32 %v4238_v47 }
0x17de   :  { %v3958_v54 = vpop.eup %3957 }
0x17df   :  { %952 = vrot.lane.b32.xlu0 %v3958_v54, %s4025_s18 }
0x1851   :  { %v953_v55 = vpop.permute.xlu0 %952 }
0x1852   :  { %v955_v56 = vmul.f32 %v3956_v43, %v953_v55 }
0x1854   :  { %968 = vrot.lane.b32.xlu1 %v955_v56, %s4026_s19 }
0x18c6   :  { %v969_v57 = vpop.permute.xlu1 %968 }
0x18c7   :  { %3260 = vmatmul.mubr.msk.f32.vlgmr.msra.gmra.mrb[8].mxu1 %vm38_vm1, %v969_v57 }
0x18c8   :  { %3690 = vmatpush3.bf16.msra.mxu1 %v4217_v29  ;;  %3305 = vmatprep.mubr.msk.f32.mxu1 %vm4023_vm0, %v4024_v6 }
0x18c9   :  { %3691 = vmatprep.subr.bf16.mxu1 %v4022_v3 }
0x18cc   :  { %3693 = vmatpush3.bf16.msra.mxu1 %v4223_v31 }
0x18cd   :  { %3694 = vmatprep.subr.bf16.mxu1 %v4022_v3 }
0x18cf   :  { %3306 = vmatmul.mubr.msk.f32.vlgmr.msra.gmra.mrb[10].mxu1 %vm38_vm1, %v969_v57 }
0x18d0   :  { %3696 = vmatpush3.bf16.msra.mxu1 %v4250_v51  ;;  %3316 = vmatprep.mubr.msk.f32.mxu1 %vm4023_vm0, %v4024_v6 }
0x18d1   :  { %3697 = vmatprep.subr.bf16.mxu1 %v4022_v3 }
0x18d4   :  { %3699 = vmatpush3.bf16.msra.mxu1 %v4256_v53 }
0x18d5   :  { %3700 = vmatprep.subr.bf16.mxu1 %v4022_v3 }
0x199a   :  { %v1038_v59 = vpop.f32.mrb[8].mxu1 }
0x199b   :  { %v1039_v60 = vadd.f32 %v4280_v58, %v1038_v59  ;;  %v3261_v61 = vpop.f32.mrb[9].mxu1 }
0x199d   :  { %1042 = vst [vmem:[%s4707_s8] sm:$0xff] %v1039_v60  ;;  %1045 = vmax.xlane.f32.xlu0 %v1039_v60 }
0x19a2   :  { %v4286_v62 = vpop.f32.mrb[10].mxu1 }
0x19a3   :  { %v3307_v63 = vpop.f32.mrb[11].mxu1 }
0x1a2a   :  { %v1046_v2 = vpop.xlane.xlu0 %1045 }
0x1a2b   :  { %vm1047_vm2 = vcmp.eq.f32.partialorder %v1039_v60, %v1046_v2 }
0x1a2c   :  { %v1048_v5 = vsel %vm1047_vm2, %v4288_v1, 128 }
0x1a2d   :  { %v1050_v8 = vshra.s32 %v1048_v5, 16  ;;  %v1049_v33 = vand.u32 65535, %v1048_v5 }
0x1a2f   :  { %v1052_v9 = vcvt.s32.f32 %v1050_v8  ;;  %v1051_v35 = vcvt.s32.f32 %v1049_v33 }
0x1a31   :  { %1053 = vmin.xlane.f32.xlu1 %v1052_v9 }
0x1abe   :  { %v1054_v34 = vpop.xlane.xlu1 %1053 }
0x1abf   :  { %vm1055_vm3 = vcmp.eq.f32.partialorder %v1052_v9, %v1054_v34  ;;  %v1060_v40 = vcvt.f32.s32 %v1054_v34 }
0x1ac0   :  { %v1056_v36 = vsel %vm1055_vm3, %v1051_v35, inf  ;;  %v1459_v35 = vstv %s1458_s26 }
0x1ac1   :  { %1057 = vmin.xlane.f32.xlu0 %v1056_v36  ;;  %v1061_v42 = vshll.u32 %v1060_v40, 16  ;;  %v2898_v36 = vld [vmem:[%s4702_s3 + $0x10] sm:$0xff]  ;;  %vm1460_vm9 = vcmp.eq.s32.totalorder %v1459_v35, 1 }
0x1b4e   :  { %v1058_v41 = vpop.xlane.xlu0 %1057 }
0x1b4f   :  { %v1059_v4 = vcvt.f32.s32 %v1058_v41 }
0x1b51   :  { %v1062_v43 = vadd.s32 %v1061_v42, %v1059_v4 }
0x1b53   :  { %vm1063_vm4 = vcmp.eq.s32.totalorder %v4288_v1, %v1062_v43 }
0x1b54   :  { %3295 = vmatmul.mubr.msk.f32.vlgmr.msra.gmra.mrb[10].mxu0 %vm1063_vm4, %v4027_v44 }
0x1b55   :  { %3726 = vmatpush3.bf16.msra.mxu0 %v4217_v29  ;;  %3362 = vmatprep.mubr.msk.f32.mxu0 %vm4023_vm0, %v4024_v6 }
0x1b56   :  { %3727 = vmatprep.subr.bf16.mxu0 %v4022_v3 }
0x1b59   :  { %3729 = vmatpush3.bf16.msra.mxu0 %v4223_v31 }
0x1b5a   :  { %3730 = vmatprep.subr.bf16.mxu0 %v4022_v3 }
0x1c27   :  { %v1148_v46 = vpop.f32.mrb[10].mxu0 }
0x1c28   :  { %v1159_v48 = vsel %vm1158_vm5, %v2889_v7, %v1148_v46  ;;  %v3296_v49 = vpop.f32.mrb[11].mxu0 }
0x1c29   :  { %v1234_v50 = vadd.f32 %v4286_v62, %v1159_v48 }
0x1c2b   :  { %3959 = vtanh.f32 %v1234_v50  ;;  %v2891_v54 = vmul.f32 -1.442695, %v1234_v50 }
0x1c2d   :  { %3961 = vpow2.f32 %v2891_v54 }
0x1c35   :  { %v3960_v52 = vpop.eup %3959 }
0x1c36   :  { %1244 = vrot.lane.b32.xlu0 %v3960_v52, %s4025_s18 }
0x1c37   :  { %v3962_v55 = vpop.eup %3961 }
0x1c38   :  { %v1238_v56 = vadd.f32 1.0, %v3962_v55 }
0x1c3a   :  { %3963 = vrcp.f32 %v1238_v56 }
0x1c44   :  { %v3964_v57 = vpop.eup %3963 }
0x1c45   :  { %v1242_v61 = vmul.f32 %v3964_v57, %v4238_v47 }
0x1ca8   :  { %v1245_v59 = vpop.permute.xlu0 %1244 }
0x1ca9   :  { %v1247_v60 = vmul.f32 %v3964_v57, %v1245_v59 }
0x1cab   :  { %1249 = vrot.lane.b32.xlu1 %v1247_v60, %s4026_s19 }
0x1d1d   :  { %v1250_v63 = vpop.permute.xlu1 %1249 }
0x1d1e   :  { %v4386_v0 = vadd.f32 %v1250_v63, %v1242_v61 }
0x1d20   :  { %3965 = vtanh.f32 %v4386_v0 }
0x1d2a   :  { %v3966_v62 = vpop.eup %3965 }
0x1d2b   :  { %1255 = vrot.lane.b32.xlu1 %v3966_v62, %s4025_s18 }
0x1d9d   :  { %v1256_v2 = vpop.permute.xlu1 %1255 }
0x1d9e   :  { %v1258_v5 = vmul.f32 %v3964_v57, %v1256_v2 }
0x1da0   :  { %1271 = vrot.lane.b32.xlu0 %v1258_v5, %s4026_s19 }
0x1e12   :  { %v1272_v8 = vpop.permute.xlu0 %1271 }
0x1e13   :  { %3317 = vmatmul.mubr.msk.f32.vlgmr.msra.gmra.mrb[12].mxu1 %vm38_vm1, %v1272_v8  ;;  %3363 = vmatmul.mubr.msk.f32.vlgmr.msra.gmra.mrb[12].mxu0 %vm38_vm1, %v1272_v8 }
0x1e14   :  { %3702 = vmatpush3.bf16.msra.mxu1 %v4300_v13  ;;  %3351 = vmatprep.mubr.msk.f32.mxu1 %vm4023_vm0, %v4024_v6 }
0x1e15   :  { %3703 = vmatprep.subr.bf16.mxu1 %v4022_v3  ;;  %3732 = vmatpush3.bf16.msra.mxu0 %v4250_v51 }
0x1e16   :  { %3733 = vmatprep.subr.bf16.mxu0 %v4022_v3  ;;  %3373 = vmatprep.mubr.msk.f32.mxu0 %vm4023_vm0, %v4024_v6 }
0x1e18   :  { %3705 = vmatpush3.bf16.msra.mxu1 %v4306_v15 }
0x1e19   :  { %3706 = vmatprep.subr.bf16.mxu1 %v4022_v3  ;;  %3735 = vmatpush3.bf16.msra.mxu0 %v4256_v53 }
0x1e1a   :  { %3736 = vmatprep.subr.bf16.mxu0 %v4022_v3 }
0x1e1c   :  { %3708 = vmatpush3.bf16.msra.mxu1 %v4316_v18 }
0x1e1d   :  { %3709 = vmatprep.subr.bf16.mxu1 %v4022_v3 }
0x1e20   :  { %3711 = vmatpush3.bf16.msra.mxu1 %v4326_v21 }
0x1e21   :  { %3712 = vmatprep.subr.bf16.mxu1 %v4022_v3 }
0x1e24   :  { %3714 = vmatpush3.bf16.msra.mxu1 %v4336_v24 }
0x1e25   :  { %3715 = vmatprep.subr.bf16.mxu1 %v4022_v3 }
0x1e28   :  { %3717 = vmatpush3.bf16.msra.mxu1 %v4346_v27 }
0x1e29   :  { %3718 = vmatprep.subr.bf16.mxu1 %v4022_v3 }
0x1e2c   :  { %3720 = vmatpush3.bf16.msra.mxu1 %v4356_v32 }
0x1e2d   :  { %3721 = vmatprep.subr.bf16.mxu1 %v4022_v3 }
0x1e30   :  { %3723 = vmatpush3.bf16.msra.mxu1 %v4367_v39 }
0x1e31   :  { %3760 = vmatprep.subr.bf16.mxu1 %v4022_v3 }
0x1ee6   :  { %v1341_v47 = vpop.f32.mrb[12].mxu1  ;;  %v1532_v9 = vpop.f32.mrb[12].mxu0 }
0x1ee7   :  { %v1342_v10 = vadd.f32 %v4280_v58, %v1341_v47  ;;  %v3318_v11 = vpop.f32.mrb[13].mxu1  ;;  %v3364_v12 = vpop.f32.mrb[13].mxu0 }
0x1ee9   :  { %2894 = vst [vmem:[%s4707_s8 + $0x8] sm:$0xff] %v1342_v10  ;;  %1347 = vmax.xlane.f32.xlu1 %v1342_v10 }
0x1f76   :  { %v1348_v14 = vpop.xlane.xlu1 %1347 }
0x1f77   :  { %vm1349_vm6 = vcmp.eq.f32.partialorder %v1342_v10, %v1348_v14 }
0x1f78   :  { %v1350_v16 = vsel %vm1349_vm6, %v4288_v1, 128 }
0x1f79   :  { %v1352_v17 = vshra.s32 %v1350_v16, 16  ;;  %v1351_v20 = vand.u32 65535, %v1350_v16 }
0x1f7b   :  { %v1354_v19 = vcvt.s32.f32 %v1352_v17  ;;  %v1353_v23 = vcvt.s32.f32 %v1351_v20  ;;  %v1761_v20 = vstv %s1760_s10 }
0x1f7c   :  { %vm1762_vm13 = vcmp.eq.s32.totalorder %v1761_v20, 1 }
0x1f7d   :  { %1355 = vmin.xlane.f32.xlu0 %v1354_v19 }
0x200a   :  { %v1356_v22 = vpop.xlane.xlu0 %1355 }
0x200b   :  { %vm1357_vm7 = vcmp.eq.f32.partialorder %v1354_v19, %v1356_v22  ;;  %v1362_v26 = vcvt.f32.s32 %v1356_v22  ;;  %v2907_v22 = vld [vmem:[%s4702_s3 + $0x18] sm:$0xff] }
0x200c   :  { %v1358_v25 = vsel %vm1357_vm7, %v1353_v23, inf }
0x200d   :  { %1359 = vmin.xlane.f32.xlu0 %v1358_v25  ;;  %v1363_v30 = vshll.u32 %v1362_v26, 16 }
0x209a   :  { %v1360_v28 = vpop.xlane.xlu0 %1359 }
0x209b   :  { %v1361_v33 = vcvt.f32.s32 %v1360_v28 }
0x209d   :  { %v1364_v34 = vadd.s32 %v1363_v30, %v1361_v33 }
0x209f   :  { %vm1365_vm8 = vcmp.eq.s32.totalorder %v4288_v1, %v1364_v34 }
0x20a0   :  { %3352 = vmatmul.mubr.msk.f32.vlgmr.msra.gmra.mrb[14].mxu1 %vm1365_vm8, %v4027_v44 }
0x20a1   :  { %3762 = vmatpush3.bf16.msra.mxu1 %v4217_v29  ;;  %3419 = vmatprep.mubr.msk.f32.mxu1 %vm4023_vm0, %v4024_v6 }
0x20a2   :  { %3763 = vmatprep.subr.bf16.mxu1 %v4022_v3 }
0x20a5   :  { %3765 = vmatpush3.bf16.msra.mxu1 %v4223_v31 }
0x20a6   :  { %3766 = vmatprep.subr.bf16.mxu1 %v4022_v3 }
0x2173   :  { %v1450_v37 = vpop.f32.mrb[14].mxu1 }
0x2174   :  { %v1461_v38 = vsel %vm1460_vm9, %v2898_v36, %v1450_v37  ;;  %v3353_v40 = vpop.f32.mrb[15].mxu1 }
0x2175   :  { %v1536_v41 = vadd.f32 %v1532_v9, %v1461_v38 }
0x2177   :  { %3967 = vtanh.f32 %v1536_v41  ;;  %v2900_v4 = vmul.f32 -1.442695, %v1536_v41 }
0x2179   :  { %3969 = vpow2.f32 %v2900_v4 }
0x2181   :  { %v3968_v42 = vpop.eup %3967 }
0x2182   :  { %1546 = vrot.lane.b32.xlu1 %v3968_v42, %s4025_s18 }
0x2183   :  { %v3970_v43 = vpop.eup %3969 }
0x2184   :  { %v1540_v45 = vadd.f32 1.0, %v3970_v43 }
0x2186   :  { %3971 = vrcp.f32 %v1540_v45 }
0x2190   :  { %v3972_v7 = vpop.eup %3971 }
0x2191   :  { %v1544_v49 = vmul.f32 %v3972_v7, %v4386_v0 }
0x21f4   :  { %v1547_v46 = vpop.permute.xlu1 %1546 }
0x21f5   :  { %v1549_v48 = vmul.f32 %v3972_v7, %v1547_v46 }
0x21f7   :  { %1551 = vrot.lane.b32.xlu0 %v1549_v48, %s4026_s19 }
0x2269   :  { %v1552_v50 = vpop.permute.xlu0 %1551 }
0x226a   :  { %v4436_v52 = vadd.f32 %v1552_v50, %v1544_v49 }
0x226c   :  { %3973 = vtanh.f32 %v4436_v52 }
0x2276   :  { %v3974_v54 = vpop.eup %3973 }
0x2277   :  { %1557 = vrot.lane.b32.xlu1 %v3974_v54, %s4025_s18 }
0x22e9   :  { %v1558_v55 = vpop.permute.xlu1 %1557 }
0x22ea   :  { %v1560_v56 = vmul.f32 %v3972_v7, %v1558_v55 }
0x22ec   :  { %1573 = vrot.lane.b32.xlu1 %v1560_v56, %s4026_s19 }
0x235e   :  { %v1574_v57 = vpop.permute.xlu1 %1573 }
0x235f   :  { %3374 = vmatmul.mubr.msk.f32.vlgmr.msra.gmra.mrb[14].mxu0 %vm38_vm1, %v1574_v57  ;;  %3420 = vmatmul.mubr.msk.f32.vlgmr.msra.gmra.mrb[16].mxu1 %vm38_vm1, %v1574_v57 }
0x2360   :  { %3738 = vmatpush3.bf16.msra.mxu0 %v4300_v13  ;;  %3408 = vmatprep.mubr.msk.f32.mxu0 %vm4023_vm0, %v4024_v6 }
0x2361   :  { %3739 = vmatprep.subr.bf16.mxu0 %v4022_v3  ;;  %3768 = vmatpush3.bf16.msra.mxu1 %v4250_v51 }
0x2362   :  { %3769 = vmatprep.subr.bf16.mxu1 %v4022_v3  ;;  %3430 = vmatprep.mubr.msk.f32.mxu1 %vm4023_vm0, %v4024_v6 }
0x2364   :  { %3741 = vmatpush3.bf16.msra.mxu0 %v4306_v15 }
0x2365   :  { %3742 = vmatprep.subr.bf16.mxu0 %v4022_v3  ;;  %3771 = vmatpush3.bf16.msra.mxu1 %v4256_v53 }
0x2366   :  { %3772 = vmatprep.subr.bf16.mxu1 %v4022_v3 }
0x2368   :  { %3744 = vmatpush3.bf16.msra.mxu0 %v4316_v18 }
0x2369   :  { %3745 = vmatprep.subr.bf16.mxu0 %v4022_v3 }
0x236c   :  { %3747 = vmatpush3.bf16.msra.mxu0 %v4326_v21 }
0x236d   :  { %3748 = vmatprep.subr.bf16.mxu0 %v4022_v3 }
0x2370   :  { %3750 = vmatpush3.bf16.msra.mxu0 %v4336_v24 }
0x2371   :  { %3751 = vmatprep.subr.bf16.mxu0 %v4022_v3 }
0x2374   :  { %3753 = vmatpush3.bf16.msra.mxu0 %v4346_v27 }
0x2375   :  { %3754 = vmatprep.subr.bf16.mxu0 %v4022_v3 }
0x2378   :  { %3756 = vmatpush3.bf16.msra.mxu0 %v4356_v32 }
0x2379   :  { %3757 = vmatprep.subr.bf16.mxu0 %v4022_v3 }
0x237c   :  { %3759 = vmatpush3.bf16.msra.mxu0 %v4367_v39 }
0x237d   :  { %3796 = vmatprep.subr.bf16.mxu0 %v4022_v3 }
0x2432   :  { %v1643_v59 = vpop.f32.mrb[14].mxu0  ;;  %v1834_v60 = vpop.f32.mrb[16].mxu1 }
0x2433   :  { %v1644_v61 = vadd.f32 %v4280_v58, %v1643_v59  ;;  %v3375_v63 = vpop.f32.mrb[15].mxu0  ;;  %v3421_v0 = vpop.f32.mrb[17].mxu1 }
0x2435   :  { %2903 = vst [vmem:[%s4707_s8 + $0x10] sm:$0xff] %v1644_v61  ;;  %1649 = vmax.xlane.f32.xlu0 %v1644_v61 }
0x24c2   :  { %v1650_v62 = vpop.xlane.xlu0 %1649 }
0x24c3   :  { %vm1651_vm10 = vcmp.eq.f32.partialorder %v1644_v61, %v1650_v62  ;;  %v2063_v62 = vstv %s2062_s14 }
0x24c4   :  { %v1652_v2 = vsel %vm1651_vm10, %v4288_v1, 128  ;;  %vm2064_vm3 = vcmp.eq.s32.totalorder %v2063_v62, 1  ;;  %v2467_v62 = vld [vmem:[%s4705_s6] sm:$0xff] }
0x24c5   :  { %v1654_v5 = vshra.s32 %v1652_v2, 16  ;;  %v1653_v47 = vand.u32 65535, %v1652_v2  ;;  %v2916_v2 = vld [vmem:[%s4702_s3 + $0x20] sm:$0xff] }
0x24c7   :  { %v1656_v8 = vcvt.s32.f32 %v1654_v5  ;;  %v1655_v10 = vcvt.s32.f32 %v1653_v47 }
0x24c9   :  { %1657 = vmin.xlane.f32.xlu1 %v1656_v8 }
0x2556   :  { %v1658_v9 = vpop.xlane.xlu1 %1657 }
0x2557   :  { %vm1659_vm11 = vcmp.eq.f32.partialorder %v1656_v8, %v1658_v9  ;;  %v1664_v12 = vcvt.f32.s32 %v1658_v9 }
0x2558   :  { %v1660_v11 = vsel %vm1659_vm11, %v1655_v10, inf }
0x2559   :  { %1661 = vmin.xlane.f32.xlu0 %v1660_v11  ;;  %v1665_v16 = vshll.u32 %v1664_v12, 16 }
0x25e6   :  { %v1662_v14 = vpop.xlane.xlu0 %1661 }
0x25e7   :  { %v1663_v17 = vcvt.f32.s32 %v1662_v14 }
0x25e9   :  { %v1666_v19 = vadd.s32 %v1665_v16, %v1663_v17 }
0x25eb   :  { %vm1667_vm12 = vcmp.eq.s32.totalorder %v4288_v1, %v1666_v19 }
0x25ec   :  { %3409 = vmatmul.mubr.msk.f32.vlgmr.msra.gmra.mrb[16].mxu0 %vm1667_vm12, %v4027_v44 }
0x25ed   :  { %3798 = vmatpush3.bf16.msra.mxu0 %v4217_v29  ;;  %3476 = vmatprep.mubr.msk.f32.mxu0 %vm4023_vm0, %v4024_v6 }
0x25ee   :  { %3799 = vmatprep.subr.bf16.mxu0 %v4022_v3 }
0x25f1   :  { %3801 = vmatpush3.bf16.msra.mxu0 %v4223_v31 }
0x25f2   :  { %3802 = vmatprep.subr.bf16.mxu0 %v4022_v3 }
0x26bf   :  { %v1752_v23 = vpop.f32.mrb[16].mxu0 }
0x26c0   :  { %v1763_v29 = vsel %vm1762_vm13, %v2907_v22, %v1752_v23  ;;  %v3410_v25 = vpop.f32.mrb[17].mxu0 }
0x26c1   :  { %v1838_v26 = vadd.f32 %v1834_v60, %v1763_v29  ;;  %v2368_v29 = vld [vmem:[%s4704_s5] sm:$0xff]  ;;  %v2369_v25 = vld [vmem:[%s4704_s5 + $0x8] sm:$0xff] }
0x26c3   :  { %3975 = vtanh.f32 %v1838_v26  ;;  %v2909_v31 = vmul.f32 -1.442695, %v1838_v26  ;;  %v2370_v26 = vld [vmem:[%s4704_s5 + $0x10] sm:$0xff] }
0x26c5   :  { %3977 = vpow2.f32 %v2909_v31  ;;  %v2371_v31 = vld [vmem:[%s4704_s5 + $0x18] sm:$0xff] }
0x26cd   :  { %v3976_v28 = vpop.eup %3975 }
0x26ce   :  { %1848 = vrot.lane.b32.xlu0 %v3976_v28, %s4025_s18  ;;  %v3833_v28 = vpack.c.bf16 %v2369_v25, %v2368_v29 }
0x26cf   :  { %v3978_v30 = vpop.eup %3977 }
0x26d0   :  { %v1842_v33 = vadd.f32 1.0, %v3978_v30  ;;  %v3836_v30 = vpack.c.bf16 %v2371_v31, %v2370_v26  ;;  %v2577_v31 = vld [vmem:[%s4703_s4 + $0x8] sm:$0xff] }
0x26d2   :  { %3979 = vrcp.f32 %v1842_v33 }
0x26dc   :  { %v3980_v34 = vpop.eup %3979 }
0x26dd   :  { %v1846_v37 = vmul.f32 %v3980_v34, %v4436_v52 }
0x2740   :  { %v1849_v35 = vpop.permute.xlu0 %1848 }
0x2741   :  { %v1851_v36 = vmul.f32 %v3980_v34, %v1849_v35 }
0x2743   :  { %1853 = vrot.lane.b32.xlu1 %v1851_v36, %s4026_s19 }
0x27b5   :  { %v1854_v38 = vpop.permute.xlu1 %1853 }
0x27b6   :  { %v4486_v40 = vadd.f32 %v1854_v38, %v1846_v37 }
0x27b8   :  { %3981 = vtanh.f32 %v4486_v40 }
0x27c2   :  { %v3982_v41 = vpop.eup %3981 }
0x27c3   :  { %1859 = vrot.lane.b32.xlu1 %v3982_v41, %s4025_s18 }
0x2835   :  { %v1860_v42 = vpop.permute.xlu1 %1859 }
0x2836   :  { %v1862_v4 = vmul.f32 %v3980_v34, %v1860_v42 }
0x2838   :  { %1875 = vrot.lane.b32.xlu0 %v1862_v4, %s4026_s19 }
0x28aa   :  { %v1876_v43 = vpop.permute.xlu0 %1875 }
0x28ab   :  { %3431 = vmatmul.mubr.msk.f32.vlgmr.msra.gmra.mrb[18].mxu1 %vm38_vm1, %v1876_v43  ;;  %3477 = vmatmul.mubr.msk.f32.vlgmr.msra.gmra.mrb[18].mxu0 %vm38_vm1, %v1876_v43 }
0x28ac   :  { %3774 = vmatpush3.bf16.msra.mxu1 %v4300_v13  ;;  %3465 = vmatprep.mubr.msk.f32.mxu1 %vm4023_vm0, %v4024_v6 }
0x28ad   :  { %3775 = vmatprep.subr.bf16.mxu1 %v4022_v3  ;;  %3804 = vmatpush3.bf16.msra.mxu0 %v4250_v51 }
0x28ae   :  { %3805 = vmatprep.subr.bf16.mxu0 %v4022_v3  ;;  %3487 = vmatprep.mubr.msk.f32.mxu0 %vm4023_vm0, %v4024_v6 }
0x28b0   :  { %3777 = vmatpush3.bf16.msra.mxu1 %v4306_v15 }
0x28b1   :  { %3778 = vmatprep.subr.bf16.mxu1 %v4022_v3  ;;  %3807 = vmatpush3.bf16.msra.mxu0 %v4256_v53 }
0x28b2   :  { %3808 = vmatprep.subr.bf16.mxu0 %v4022_v3 }
0x28b4   :  { %3780 = vmatpush3.bf16.msra.mxu1 %v4316_v18 }
0x28b5   :  { %3781 = vmatprep.subr.bf16.mxu1 %v4022_v3 }
0x28b8   :  { %3783 = vmatpush3.bf16.msra.mxu1 %v4326_v21 }
0x28b9   :  { %3784 = vmatprep.subr.bf16.mxu1 %v4022_v3 }
0x28bc   :  { %3786 = vmatpush3.bf16.msra.mxu1 %v4336_v24 }
0x28bd   :  { %3787 = vmatprep.subr.bf16.mxu1 %v4022_v3 }
0x28c0   :  { %3789 = vmatpush3.bf16.msra.mxu1 %v4346_v27 }
0x28c1   :  { %3790 = vmatprep.subr.bf16.mxu1 %v4022_v3 }
0x28c4   :  { %3792 = vmatpush3.bf16.msra.mxu1 %v4356_v32 }
0x28c5   :  { %3793 = vmatprep.subr.bf16.mxu1 %v4022_v3 }
0x28c8   :  { %3795 = vmatpush3.bf16.msra.mxu1 %v4367_v39 }
0x28c9   :  { %3832 = vmatprep.subr.bf16.mxu1 %v4022_v3 }
0x297e   :  { %v1945_v51 = vpop.f32.mrb[18].mxu1  ;;  %v2136_v53 = vpop.f32.mrb[18].mxu0 }
0x297f   :  { %v1946_v45 = vadd.f32 %v4280_v58, %v1945_v51  ;;  %v3432_v7 = vpop.f32.mrb[19].mxu1  ;;  %v3478_v46 = vpop.f32.mrb[19].mxu0 }
0x2980   :  { %v2925_v7 = vld [vmem:[%s4702_s3 + $0x28] sm:$0xff] }
0x2981   :  { %2912 = vst [vmem:[%s4707_s8 + $0x18] sm:$0xff] %v1946_v45  ;;  %1951 = vmax.xlane.f32.xlu1 %v1946_v45 }
0x2a0e   :  { %v1952_v48 = vpop.xlane.xlu1 %1951 }
0x2a0f   :  { %vm1953_vm14 = vcmp.eq.f32.partialorder %v1946_v45, %v1952_v48  ;;  %v2365_v45 = vstv %s2364_s28 }
0x2a10   :  { %v1954_v49 = vsel %vm1953_vm14, %v4288_v1, 128  ;;  %vm2366_vm7 = vcmp.eq.s32.totalorder %v2365_v45, 1  ;;  %v2590_v45 = vld [vmem:[%s4703_s4 + $0x70] sm:$0xff] }
0x2a11   :  { %v1956_v50 = vshra.s32 %v1954_v49, 16  ;;  %v1955_v54 = vand.u32 65535, %v1954_v49 }
0x2a13   :  { %v1958_v52 = vcvt.s32.f32 %v1956_v50  ;;  %v1957_v56 = vcvt.s32.f32 %v1955_v54 }
0x2a15   :  { %1959 = vmin.xlane.f32.xlu0 %v1958_v52 }
0x2aa2   :  { %v1960_v55 = vpop.xlane.xlu0 %1959 }
0x2aa3   :  { %vm1961_vm15 = vcmp.eq.f32.partialorder %v1958_v52, %v1960_v55  ;;  %v1966_v59 = vcvt.f32.s32 %v1960_v55 }
0x2aa4   :  { %v1962_v57 = vsel %vm1961_vm15, %v1957_v56, inf }
0x2aa5   :  { %1963 = vmin.xlane.f32.xlu0 %v1962_v57  ;;  %v1967_v61 = vshll.u32 %v1966_v59, 16 }
0x2b32   :  { %v1964_v60 = vpop.xlane.xlu0 %1963 }
0x2b33   :  { %v1965_v63 = vcvt.f32.s32 %v1964_v60 }
0x2b35   :  { %v1968_v0 = vadd.s32 %v1967_v61, %v1965_v63 }
0x2b37   :  { %vm1969_vm2 = vcmp.eq.s32.totalorder %v4288_v1, %v1968_v0 }
0x2b38   :  { %3466 = vmatmul.mubr.msk.f32.vlgmr.msra.gmra.mrb[20].mxu1 %vm1969_vm2, %v4027_v44 }
0x2b39   :  { %3533 = vmatprep.mubr.msk.f32.mxu1 %vm4023_vm0, %v4024_v6  ;;  %3834 = vmatpush3.bf16.msra.mxu1 %v3833_v28 }
0x2b3a   :  { %3835 = vmatprep.subr.bf16.mxu1 %v4022_v3 }
0x2b3d   :  { %3837 = vmatpush3.bf16.msra.mxu1 %v3836_v30 }
0x2b3e   :  { %3838 = vmatprep.subr.bf16.mxu1 %v4022_v3 }
0x2c0b   :  { %v2054_v5 = vpop.f32.mrb[20].mxu1 }
0x2c0c   :  { %v2065_v8 = vsel %vm2064_vm3, %v2916_v2, %v2054_v5  ;;  %v3467_v47 = vpop.f32.mrb[21].mxu1  ;;  %v2468_v2 = vld [vmem:[%s4705_s6 + $0x8] sm:$0xff]  ;;  %v2469_v5 = vld [vmem:[%s4705_s6 + $0x10] sm:$0xff] }
0x2c0d   :  { %v2140_v9 = vadd.f32 %v2136_v53, %v2065_v8  ;;  %v3839_v8 = vpack.c.bf16 %v2468_v2, %v2467_v62  ;;  %v2470_v47 = vld [vmem:[%s4705_s6 + $0x18] sm:$0xff] }
0x2c0f   :  { %3983 = vtanh.f32 %v2140_v9  ;;  %v2918_v11 = vmul.f32 -1.442695, %v2140_v9  ;;  %v3842_v9 = vpack.c.bf16 %v2470_v47, %v2469_v5 }
0x2c11   :  { %3985 = vpow2.f32 %v2918_v11 }
0x2c19   :  { %v3984_v10 = vpop.eup %3983 }
0x2c1a   :  { %2150 = vrot.lane.b32.xlu1 %v3984_v10, %s4025_s18 }
0x2c1b   :  { %v3986_v12 = vpop.eup %3985 }
0x2c1c   :  { %v2144_v14 = vadd.f32 1.0, %v3986_v12 }
0x2c1e   :  { %3987 = vrcp.f32 %v2144_v14 }
0x2c28   :  { %v3988_v16 = vpop.eup %3987 }
0x2c29   :  { %v2148_v20 = vmul.f32 %v3988_v16, %v4486_v40 }
0x2c8c   :  { %v2151_v17 = vpop.permute.xlu1 %2150 }
0x2c8d   :  { %v2153_v19 = vmul.f32 %v3988_v16, %v2151_v17 }
0x2c8f   :  { %2155 = vrot.lane.b32.xlu0 %v2153_v19, %s4026_s19 }
0x2d01   :  { %v2156_v22 = vpop.permute.xlu0 %2155 }
0x2d02   :  { %v4532_v23 = vadd.f32 %v2156_v22, %v2148_v20 }
0x2d04   :  { %3989 = vtanh.f32 %v4532_v23 }
0x2d0e   :  { %v3990_v33 = vpop.eup %3989 }
0x2d0f   :  { %2161 = vrot.lane.b32.xlu1 %v3990_v33, %s4025_s18 }
0x2d81   :  { %v2162_v34 = vpop.permute.xlu1 %2161 }
0x2d82   :  { %v2164_v35 = vmul.f32 %v3988_v16, %v2162_v34  ;;  %v4619_v16 = vld [vmem:[%s4706_s7] ss:$0 sm:$0xff]  ;;  %v2579_v34 = vld [vmem:[%s4703_s4 + $0x18] sm:$0xff] }
0x2d84   :  { %2177 = vrot.lane.b32.xlu1 %v2164_v35, %s4026_s19 }
0x2df6   :  { %v2178_v36 = vpop.permute.xlu1 %2177 }
0x2df7   :  { %3488 = vmatmul.mubr.msk.f32.vlgmr.msra.gmra.mrb[20].mxu0 %vm38_vm1, %v2178_v36  ;;  %3534 = vmatmul.mubr.msk.f32.vlgmr.msra.gmra.mrb[22].mxu1 %vm38_vm1, %v2178_v36  ;;  %v2580_v36 = vld [vmem:[%s4703_s4 + $0x20] sm:$0xff] }
0x2df8   :  { %3810 = vmatpush3.bf16.msra.mxu0 %v4300_v13  ;;  %3522 = vmatprep.mubr.msk.f32.mxu0 %vm4023_vm0, %v4024_v6 }
0x2df9   :  { %3811 = vmatprep.subr.bf16.mxu0 %v4022_v3  ;;  %3544 = vmatprep.mubr.msk.f32.mxu1 %vm4023_vm0, %v4024_v6 }
0x2dfa   :  { %3840 = vmatpush3.bf16.msra.mxu1 %v3839_v8 }
0x2dfb   :  { %3841 = vmatprep.subr.bf16.mxu1 %v4022_v3 }
0x2dfc   :  { %3813 = vmatpush3.bf16.msra.mxu0 %v4306_v15 }
0x2dfd   :  { %3814 = vmatprep.subr.bf16.mxu0 %v4022_v3 }
0x2dfe   :  { %3843 = vmatpush3.bf16.msra.mxu1 %v3842_v9 }
0x2dff   :  { %3844 = vmatprep.subr.bf16.mxu1 %v4022_v3 }
0x2e00   :  { %3816 = vmatpush3.bf16.msra.mxu0 %v4316_v18 }
0x2e01   :  { %3817 = vmatprep.subr.bf16.mxu0 %v4022_v3 }
0x2e04   :  { %3819 = vmatpush3.bf16.msra.mxu0 %v4326_v21 }
0x2e05   :  { %3820 = vmatprep.subr.bf16.mxu0 %v4022_v3 }
0x2e08   :  { %3822 = vmatpush3.bf16.msra.mxu0 %v4336_v24 }
0x2e09   :  { %3823 = vmatprep.subr.bf16.mxu0 %v4022_v3 }
0x2e0c   :  { %3825 = vmatpush3.bf16.msra.mxu0 %v4346_v27 }
0x2e0d   :  { %3826 = vmatprep.subr.bf16.mxu0 %v4022_v3 }
0x2e10   :  { %3828 = vmatpush3.bf16.msra.mxu0 %v4356_v32 }
0x2e11   :  { %3829 = vmatprep.subr.bf16.mxu0 %v4022_v3 }
0x2e14   :  { %3831 = vmatpush3.bf16.msra.mxu0 %v4367_v39 }
0x2e15   :  { %3868 = vmatprep.subr.bf16.mxu0 %v4022_v3 }
0x2eca   :  { %v2247_v13 = vpop.f32.mrb[20].mxu0  ;;  %v2438_v15 = vpop.f32.mrb[22].mxu1 }
0x2ecb   :  { %v2248_v18 = vadd.f32 %v4280_v58, %v2247_v13  ;;  %v3489_v21 = vpop.f32.mrb[21].mxu0  ;;  %v3535_v24 = vpop.f32.mrb[23].mxu1  ;;  %v2581_v13 = vld [vmem:[%s4703_s4 + $0x28] sm:$0xff] }
0x2ecc   :  { %v2583_v21 = vld [vmem:[%s4703_s4 + $0x38] sm:$0xff] }
0x2ecd   :  { %2921 = vst [vmem:[%s4707_s8 + $0x20] sm:$0xff] %v2248_v18  ;;  %2253 = vmax.xlane.f32.xlu0 %v2248_v18 }
0x2f5a   :  { %v2254_v27 = vpop.xlane.xlu0 %2253 }
0x2f5b   :  { %vm2255_vm4 = vcmp.eq.f32.partialorder %v2248_v18, %v2254_v27  ;;  %v2582_v18 = vld [vmem:[%s4703_s4 + $0x30] sm:$0xff]  ;;  %v2584_v27 = vld [vmem:[%s4703_s4 + $0x40] sm:$0xff] }
0x2f5c   :  { %v2256_v32 = vsel %vm2255_vm4, %v4288_v1, 128  ;;  %v3854_v24 = vpack.c.bf16 %v2583_v21, %v2582_v18 }
0x2f5d   :  { %v2258_v37 = vshra.s32 %v2256_v32, 16  ;;  %v2257_v39 = vand.u32 65535, %v2256_v32  ;;  %v2585_v32 = vld [vmem:[%s4703_s4 + $0x48] sm:$0xff] }
0x2f5f   :  { %v2260_v38 = vcvt.s32.f32 %v2258_v37  ;;  %v2259_v41 = vcvt.s32.f32 %v2257_v39  ;;  %v3857_v37 = vpack.c.bf16 %v2585_v32, %v2584_v27  ;;  %v2587_v39 = vld [vmem:[%s4703_s4 + $0x58] sm:$0xff] }
0x2f61   :  { %2261 = vmin.xlane.f32.xlu1 %v2260_v38 }
0x2fee   :  { %v2262_v40 = vpop.xlane.xlu1 %2261 }
0x2fef   :  { %vm2263_vm5 = vcmp.eq.f32.partialorder %v2260_v38, %v2262_v40  ;;  %v2268_v58 = vcvt.f32.s32 %v2262_v40  ;;  %v2586_v38 = vld [vmem:[%s4703_s4 + $0x50] sm:$0xff] }
0x2ff0   :  { %v2264_v42 = vsel %vm2263_vm5, %v2259_v41, inf  ;;  %v3860_v40 = vpack.c.bf16 %v2587_v39, %v2586_v38  ;;  %v2588_v41 = vld [vmem:[%s4703_s4 + $0x60] sm:$0xff] }
0x2ff1   :  { %2265 = vmin.xlane.f32.xlu0 %v2264_v42  ;;  %v2269_v43 = vshll.u32 %v2268_v58, 16  ;;  %v2589_v42 = vld [vmem:[%s4703_s4 + $0x68] sm:$0xff] }
0x2ff2   :  { %v3863_v58 = vpack.c.bf16 %v2589_v42, %v2588_v41 }
0x307e   :  { %v2266_v4 = vpop.xlane.xlu0 %2265 }
0x307f   :  { %v2267_v51 = vcvt.f32.s32 %v2266_v4 }
0x3081   :  { %v2270_v53 = vadd.s32 %v2269_v43, %v2267_v51 }
0x3083   :  { %vm2271_vm6 = vcmp.eq.s32.totalorder %v4288_v1, %v2270_v53 }
0x3084   :  { %3523 = vmatmul.mubr.msk.f32.vlgmr.msra.gmra.mrb[22].mxu0 %vm2271_vm6, %v4027_v44 }
0x3085   :  { %3870 = vmatpush3.bf16.msra.mxu0 %v3833_v28  ;;  %3590 = vmatprep.mubr.msk.f32.mxu0 %vm4023_vm0, %v4024_v6  ;;  %v2576_v28 = vld [vmem:[%s4703_s4] sm:$0xff] }
0x3086   :  { %3871 = vmatprep.subr.bf16.mxu0 %v4022_v3  ;;  %v3845_v33 = vpack.c.bf16 %v2577_v31, %v2576_v28 }
0x3089   :  { %3873 = vmatpush3.bf16.msra.mxu0 %v3836_v30  ;;  %v2578_v30 = vld [vmem:[%s4703_s4 + $0x10] sm:$0xff] }
0x308a   :  { %3874 = vmatprep.subr.bf16.mxu0 %v4022_v3  ;;  %v3848_v35 = vpack.c.bf16 %v2579_v34, %v2578_v30 }
0x3157   :  { %v2356_v46 = vpop.f32.mrb[22].mxu0 }
0x3158   :  { %v2367_v48 = vsel %vm2366_vm7, %v2925_v7, %v2356_v46  ;;  %v3524_v49 = vpop.f32.mrb[23].mxu0  ;;  %v2591_v7 = vld [vmem:[%s4703_s4 + $0x78] sm:$0xff] }
0x3159   :  { %v2442_v50 = vadd.f32 %v2438_v15, %v2367_v48  ;;  %v3851_v15 = vpack.c.bf16 %v2581_v13, %v2580_v36  ;;  %v3866_v46 = vpack.c.bf16 %v2591_v7, %v2590_v45 }
0x315b   :  { %3991 = vtanh.f32 %v2442_v50  ;;  %v2927_v54 = vmul.f32 -1.442695, %v2442_v50 }
0x315d   :  { %3993 = vpow2.f32 %v2927_v54  ;;  %v2667_v54 = vstv %s2666_s25 }
0x315e   :  { %vm2668_vm10 = vcmp.eq.s32.totalorder %v2667_v54, 1 }
0x3165   :  { %v3992_v52 = vpop.eup %3991 }
0x3166   :  { %2452 = vrot.lane.b32.xlu0 %v3992_v52, %s4025_s18 }
0x3167   :  { %v3994_v55 = vpop.eup %3993 }
0x3168   :  { %v2446_v56 = vadd.f32 1.0, %v3994_v55  ;;  %v2934_v55 = vld [vmem:[%s4702_s3 + $0x30] sm:$0xff] }
0x316a   :  { %3995 = vrcp.f32 %v2446_v56 }
0x3174   :  { %v3996_v57 = vpop.eup %3995 }
0x3175   :  { %v2450_v61 = vmul.f32 %v3996_v57, %v4532_v23 }
0x31d8   :  { %v2453_v59 = vpop.permute.xlu0 %2452 }
0x31d9   :  { %v2455_v60 = vmul.f32 %v3996_v57, %v2453_v59 }
0x31db   :  { %2457 = vrot.lane.b32.xlu1 %v2455_v60, %s4026_s19 }
0x324d   :  { %v2458_v63 = vpop.permute.xlu1 %2457 }
0x324e   :  { %v4590_v0 = vadd.f32 %v2458_v63, %v2450_v61 }
0x3250   :  { %3997 = vtanh.f32 %v4590_v0 }
0x325a   :  { %v3998_v10 = vpop.eup %3997 }
0x325b   :  { %2463 = vrot.lane.b32.xlu1 %v3998_v10, %s4025_s18 }
0x32cd   :  { %v2464_v11 = vpop.permute.xlu1 %2463 }
0x32ce   :  { %v2466_v12 = vmul.f32 %v3996_v57, %v2464_v11 }
0x32d0   :  { %2479 = vrot.lane.b32.xlu0 %v2466_v12, %s4026_s19 }
0x3342   :  { %v2480_v14 = vpop.permute.xlu0 %2479 }
0x3343   :  { %3545 = vmatmul.mubr.msk.f32.vlgmr.msra.gmra.mrb[24].mxu1 %vm38_vm1, %v2480_v14  ;;  %3591 = vmatmul.mubr.msk.f32.vlgmr.msra.gmra.mrb[24].mxu0 %vm38_vm1, %v2480_v14 }
0x3344   :  { %3579 = vmatprep.mubr.msk.f32.mxu1 %vm4023_vm0, %v4024_v6  ;;  %3876 = vmatpush3.bf16.msra.mxu0 %v3839_v8 }
0x3345   :  { %3877 = vmatprep.subr.bf16.mxu0 %v4022_v3  ;;  %3601 = vmatprep.mubr.msk.f32.mxu0 %vm4023_vm0, %v4024_v6 }
0x3346   :  { %3846 = vmatpush3.bf16.msra.mxu1 %v3845_v33 }
0x3347   :  { %3847 = vmatprep.subr.bf16.mxu1 %v4022_v3 }
0x3348   :  { %3879 = vmatpush3.bf16.msra.mxu0 %v3842_v9 }
0x334a   :  { %3849 = vmatpush3.bf16.msra.mxu1 %v3848_v35 }
0x334b   :  { %3850 = vmatprep.subr.bf16.mxu1 %v4022_v3 }
0x334e   :  { %3852 = vmatpush3.bf16.msra.mxu1 %v3851_v15 }
0x334f   :  { %3853 = vmatprep.subr.bf16.mxu1 %v4022_v3 }
0x3352   :  { %3855 = vmatpush3.bf16.msra.mxu1 %v3854_v24 }
0x3353   :  { %3856 = vmatprep.subr.bf16.mxu1 %v4022_v3 }
0x3356   :  { %3858 = vmatpush3.bf16.msra.mxu1 %v3857_v37 }
0x3357   :  { %3859 = vmatprep.subr.bf16.mxu1 %v4022_v3 }
0x335a   :  { %3861 = vmatpush3.bf16.msra.mxu1 %v3860_v40 }
0x335b   :  { %3862 = vmatprep.subr.bf16.mxu1 %v4022_v3 }
0x335e   :  { %3864 = vmatpush3.bf16.msra.mxu1 %v3863_v58 }
0x335f   :  { %3865 = vmatprep.subr.bf16.mxu1 %v4022_v3 }
0x3362   :  { %3867 = vmatpush3.bf16.msra.mxu1 %v3866_v46 }
0x3416   :  { %v2549_v17 = vpop.f32.mrb[24].mxu1  ;;  %v4621_v19 = vpop.f32.mrb[24].mxu0 }
0x3417   :  { %v2550_v20 = vadd.f32 %v4619_v16, %v2549_v17  ;;  %v3546_v22 = vpop.f32.mrb[25].mxu1  ;;  %v3592_v23 = vpop.f32.mrb[25].mxu0 }
0x3419   :  { %2930 = vst [vmem:[%s4707_s8 + $0x28] sm:$0xff] %v2550_v20  ;;  %2555 = vmax.xlane.f32.xlu1 %v2550_v20 }
0x34a6   :  { %v2556_v29 = vpop.xlane.xlu1 %2555 }
0x34a7   :  { %vm2557_vm0 = vcmp.eq.f32.partialorder %v2550_v20, %v2556_v29 }
0x34a8   :  { %v2558_v6 = vsel %vm2557_vm0, %v4288_v1, 128 }
0x34a9   :  { %v2560_v25 = vshra.s32 %v2558_v6, 16  ;;  %v2559_v4 = vand.u32 65535, %v2558_v6 }
0x34ab   :  { %v2562_v26 = vcvt.s32.f32 %v2560_v25  ;;  %v2561_v51 = vcvt.s32.f32 %v2559_v4 }
0x34ad   :  { %2563 = vmin.xlane.f32.xlu0 %v2562_v26 }
0x353a   :  { %v2564_v43 = vpop.xlane.xlu0 %2563 }
0x353b   :  { %vm2565_vm8 = vcmp.eq.f32.partialorder %v2562_v26, %v2564_v43  ;;  %v2570_v48 = vcvt.f32.s32 %v2564_v43 }
0x353c   :  { %v2566_v53 = vsel %vm2565_vm8, %v2561_v51, inf }
0x353d   :  { %2567 = vmin.xlane.f32.xlu0 %v2566_v53  ;;  %v2571_v50 = vshll.u32 %v2570_v48, 16 }
0x35ca   :  { %v2568_v49 = vpop.xlane.xlu0 %2567 }
0x35cb   :  { %v2569_v3 = vcvt.f32.s32 %v2568_v49 }
0x35cd   :  { %v2572_v52 = vadd.s32 %v2571_v50, %v2569_v3 }
0x35cf   :  { %vm2573_vm9 = vcmp.eq.s32.totalorder %v4288_v1, %v2572_v52 }
0x35d0   :  { %3580 = vmatmul.mubr.msk.f32.vlgmr.msra.gmra.mrb[26].mxu1 %vm2573_vm9, %v4027_v44 }
0x36a3   :  { %v2658_v56 = vpop.f32.mrb[26].mxu1 }
0x36a4   :  { %v2669_v57 = vsel %vm2668_vm10, %v2934_v55, %v2658_v56  ;;  %v3581_v59 = vpop.f32.mrb[27].mxu1 }
0x36a5   :  { %v2744_v60 = vadd.f32 %v4621_v19, %v2669_v57 }
0x36a7   :  { %3999 = vtanh.f32 %v2744_v60  ;;  %v2936_v1 = vmul.f32 -1.442695, %v2744_v60 }
0x36a9   :  { %4001 = vpow2.f32 %v2936_v1 }
0x36b1   :  { %v4000_v61 = vpop.eup %3999 }
0x36b2   :  { %2754 = vrot.lane.b32.xlu1 %v4000_v61, %s4025_s18 }
0x36b3   :  { %v4002_v44 = vpop.eup %4001 }
0x36b4   :  { %v2748_v63 = vadd.f32 1.0, %v4002_v44 }
0x36b6   :  { %4003 = vrcp.f32 %v2748_v63 }
0x36c0   :  { %v4004_v62 = vpop.eup %4003 }
0x36c1   :  { %v2752_v8 = vmul.f32 %v4004_v62, %v4590_v0 }
0x3724   :  { %v2755_v2 = vpop.permute.xlu1 %2754 }
0x3725   :  { %v2757_v5 = vmul.f32 %v4004_v62, %v2755_v2 }
0x3727   :  { %2759 = vrot.lane.b32.xlu0 %v2757_v5, %s4026_s19 }
0x3799   :  { %v2760_v47 = vpop.permute.xlu0 %2759 }
0x379a   :  { %v2762_v9 = vadd.f32 %v2760_v47, %v2752_v8 }
0x379c   :  { %4005 = vtanh.f32 %v2762_v9 }
0x37a6   :  { %v4006_v10 = vpop.eup %4005 }
0x37a7   :  { %2765 = vrot.lane.b32.xlu1 %v4006_v10, %s4025_s18 }
0x3819   :  { %v2766_v11 = vpop.permute.xlu1 %2765 }
0x381a   :  { %v2768_v12 = vmul.f32 %v4004_v62, %v2766_v11 }
0x381c   :  { %2781 = vrot.lane.b32.xlu1 %v2768_v12, %s4026_s19 }
0x388e   :  { %v2782_v14 = vpop.permute.xlu1 %2781 }
0x388f   :  { %3602 = vmatmul.mubr.msk.f32.vlgmr.msra.gmra.mrb[26].mxu0 %vm38_vm1, %v2782_v14 }
0x3962   :  { %v2851_v17 = vpop.f32.mrb[26].mxu0 }
0x3963   :  { %v2852_v19 = vadd.f32 %v4619_v16, %v2851_v17  ;;  %v3603_v20 = vpop.f32.mrb[27].mxu0 }
0x3965   :  { %2939 = vst [vmem:[%s4707_s8 + $0x30] sm:$0xff] %v2852_v19 }

</bundles_post_ra>
